<compile_context>
chip_gen: v5e
topology: v5e:2x2
jax: 0.10.0
libtpu: 0.0.40
codegen_flags: <defaults>
</compile_context>

<pallas_src>
import jax
import jax.numpy as jnp
from jax.experimental import pallas as pl
from jax.experimental.pallas import tpu as pltpu


LANE = 128                      # every feature/hidden/class dim padded to this
ROW_TILE = 512                  # target node-row tile (M of the Â·H matmul)
K_TILE = 2048                   # target adjacency reduction tile (K of Â·H)
PAD_MULT = 256                  # node-dim padding granularity (decoupled from tiles)
VMEM_LIMIT = 48 * 1024 * 1024   # < 64 MiB physical on v7x; plenty for ~6 MiB working set


def _round_up(n, m):
    return ((n + m - 1) // m) * m


def _pad2(a, rows, cols, dtype):
    out = jnp.zeros((rows, cols), dtype)
    return out.at[: a.shape[0], : a.shape[1]].set(a.astype(dtype))


def _largest_dividing_tile(n, target, minimum=128):
    """Largest power-of-two-halved value of `target` that divides n (>= minimum)."""
    t = target
    while t > minimum and n % t != 0:
        t //= 2
    if n % t != 0:
        t = n
    return t


def _pick_row_tile(n_pad, target=ROW_TILE):
    t = _largest_dividing_tile(n_pad, target)
    # Keep >= 2 tiles on the parallel row axis so the v7x megacore is used.
    if n_pad // t < 2:
        half = n_pad // 2
        if half >= 8 and half % 8 == 0 and n_pad % half == 0:
            t = half
    return t


def _pick_k_tile(n_pad, target=K_TILE):
    return _largest_dividing_tile(n_pad, target)


# ---------------------------------------------------------------------------
# Kernels
# ---------------------------------------------------------------------------
def _prop_first_kernel(adj_ref, x_ref, w1_ref, b_ref, wn_ref, o_ref, acc_ref):
    """out[i] = relu( Â[i,:] @ (X @ W1) + b1 ) @ W2 ; X@W1 recomputed per k tile."""
    k = pl.program_id(1)

    xw = jnp.dot(x_ref[...], w1_ref[...],
                 preferred_element_type=jnp.float32).astype(jnp.bfloat16)
    partial = jnp.dot(adj_ref[...], xw, preferred_element_type=jnp.float32)

    @pl.when(k == 0)
    def _():
        acc_ref[...] = partial

    @pl.when(k != 0)
    def _():
        acc_ref[...] += partial

    @pl.when(k == pl.num_programs(1) - 1)
    def _():
        h = jnp.maximum(acc_ref[...] + b_ref[...], 0.0)
        o_ref[...] = jnp.dot(h.astype(jnp.bfloat16), wn_ref[...],
                             preferred_element_type=jnp.float32).astype(o_ref.dtype)


def _prop_fused_kernel(adj_ref, xw_ref, b_ref, wn_ref, o_ref, acc_ref):
    """out[i] = relu( Â[i,:] @ XW + b ) @ W_next   (k = reduction over node tiles)."""
    k = pl.program_id(1)

    partial = jnp.dot(adj_ref[...], xw_ref[...], preferred_element_type=jnp.float32)

    @pl.when(k == 0)
    def _():
        acc_ref[...] = partial

    @pl.when(k != 0)
    def _():
        acc_ref[...] += partial

    @pl.when(k == pl.num_programs(1) - 1)
    def _():
        h = jnp.maximum(acc_ref[...] + b_ref[...], 0.0)
        o_ref[...] = jnp.dot(h.astype(jnp.bfloat16), wn_ref[...],
                             preferred_element_type=jnp.float32).astype(o_ref.dtype)


def _prop_last_kernel(adj_ref, xw_ref, b_ref, o_ref, acc_ref):
    """out[i] = Â[i,:] @ XW3 + b3   (no relu, matches reference conv3)."""
    k = pl.program_id(1)

    partial = jnp.dot(adj_ref[...], xw_ref[...], preferred_element_type=jnp.float32)

    @pl.when(k == 0)
    def _():
        acc_ref[...] = partial

    @pl.when(k != 0)
    def _():
        acc_ref[...] += partial

    @pl.when(k == pl.num_programs(1) - 1)
    def _():
        o_ref[...] = (acc_ref[...] + b_ref[...]).astype(o_ref.dtype)


def _epilogue_kernel(pool_ref, h_ref, lw1_ref, lb1_ref, lw2_ref, lb2_ref,
                     o_ref, acc_ref):
    """global_add_pool -> Linear+relu -> Linear -> log_softmax over dim=0 (f32)."""
    k = pl.program_id(0)

    partial = jnp.dot(pool_ref[...], h_ref[...], preferred_element_type=jnp.float32)

    @pl.when(k == 0)
    def _():
        acc_ref[...] = partial

    @pl.when(k != 0)
    def _():
        acc_ref[...] += partial

    @pl.when(k == pl.num_programs(0) - 1)
    def _():
        g = acc_ref[...]
        g = jnp.dot(g, lw1_ref[...], preferred_element_type=jnp.float32) + lb1_ref[...]
        g = jnp.maximum(g, 0.0)
        logits = jnp.dot(g, lw2_ref[...], preferred_element_type=jnp.float32) + lb2_ref[...]
        # The reference module explicitly uses F.log_softmax(x, dim=0):
        # softmax across graphs, per class column.  Padded class columns are
        # independent (per-column normalization) and sliced off by the caller.
        m = jnp.max(logits, axis=0, keepdims=True)
        z = logits - m
        lse = jnp.log(jnp.sum(jnp.exp(z), axis=0, keepdims=True))
        o_ref[...] = z - lse


# ---------------------------------------------------------------------------
# pallas_call wrappers
# ---------------------------------------------------------------------------
def _propagate_first(adj_pad, x_pad, w1_pad, b_pad, w_next, *, row_tile, k_tile):
    n_pad = adj_pad.shape[0]
    f_pad = x_pad.shape[1]
    return pl.pallas_call(
        _prop_first_kernel,
        out_shape=jax.ShapeDtypeStruct((n_pad, LANE), jnp.bfloat16),
        grid_spec=pltpu.PrefetchScalarGridSpec(
            num_scalar_prefetch=0,
            grid=(n_pad // row_tile, n_pad // k_tile),
            in_specs=[
                pl.BlockSpec((row_tile, k_tile), lambda i, k: (i, k)),   # Â tile
                pl.BlockSpec((k_tile, f_pad), lambda i, k: (k, 0)),      # X tile
                pl.BlockSpec((f_pad, LANE), lambda i, k: (0, 0)),        # W1
                pl.BlockSpec((1, LANE), lambda i, k: (0, 0)),            # b1
                pl.BlockSpec((LANE, LANE), lambda i, k: (0, 0)),         # W2 (fused)
            ],
            out_specs=pl.BlockSpec((row_tile, LANE), lambda i, k: (i, 0)),
            scratch_shapes=[pltpu.VMEM((row_tile, LANE), jnp.float32)],
        ),
        compiler_params=pltpu.CompilerParams(
            dimension_semantics=("parallel", "arbitrary"),
            vmem_limit_bytes=VMEM_LIMIT),
    )(adj_pad, x_pad, w1_pad, b_pad, w_next)


def _propagate(adj_pad, xw, b_pad, w_next, *, row_tile, k_tile):
    n_pad = adj_pad.shape[0]
    in_specs = [
        pl.BlockSpec((row_tile, k_tile), lambda i, k: (i, k)),   # Â tile
        pl.BlockSpec((k_tile, LANE), lambda i, k: (k, 0)),       # XW tile
        pl.BlockSpec((1, LANE), lambda i, k: (0, 0)),            # bias
    ]
    args = [adj_pad, xw, b_pad]
    if w_next is not None:
        in_specs.append(pl.BlockSpec((LANE, LANE), lambda i, k: (0, 0)))
        args.append(w_next)
        kernel = _prop_fused_kernel
    else:
        kernel = _prop_last_kernel
    return pl.pallas_call(
        kernel,
        out_shape=jax.ShapeDtypeStruct((n_pad, LANE), jnp.bfloat16),
        grid_spec=pltpu.PrefetchScalarGridSpec(
            num_scalar_prefetch=0,
            grid=(n_pad // row_tile, n_pad // k_tile),
            in_specs=in_specs,
            out_specs=pl.BlockSpec((row_tile, LANE), lambda i, k: (i, 0)),
            scratch_shapes=[pltpu.VMEM((row_tile, LANE), jnp.float32)],
        ),
        compiler_params=pltpu.CompilerParams(
            dimension_semantics=("parallel", "arbitrary"),
            vmem_limit_bytes=VMEM_LIMIT),
    )(*args)


def _epilogue(pool_pad, h3, lw1_p, lb1_p, lw2_p, lb2_p, *, k_tile):
    n_graphs, n_pad = pool_pad.shape
    return pl.pallas_call(
        _epilogue_kernel,
        out_shape=jax.ShapeDtypeStruct((n_graphs, LANE), jnp.float32),
        grid_spec=pltpu.PrefetchScalarGridSpec(
            num_scalar_prefetch=0,
            grid=(n_pad // k_tile,),
            in_specs=[
                pl.BlockSpec((n_graphs, k_tile), lambda k: (0, k)),
                pl.BlockSpec((k_tile, LANE), lambda k: (k, 0)),
                pl.BlockSpec((LANE, LANE), lambda k: (0, 0)),
                pl.BlockSpec((1, LANE), lambda k: (0, 0)),
                pl.BlockSpec((LANE, LANE), lambda k: (0, 0)),
                pl.BlockSpec((1, LANE), lambda k: (0, 0)),
            ],
            out_specs=pl.BlockSpec((n_graphs, LANE), lambda k: (0, 0)),
            scratch_shapes=[pltpu.VMEM((n_graphs, LANE), jnp.float32)],
        ),
        compiler_params=pltpu.CompilerParams(
            dimension_semantics=("arbitrary",),
            vmem_limit_bytes=VMEM_LIMIT),
    )(pool_pad, h3, lw1_p, lb1_p, lw2_p, lb2_p)


# ---------------------------------------------------------------------------
# Full forward pass
# ---------------------------------------------------------------------------
def gcn_forward(adj_norm, x, params, pool):
    (w1, b1, w2, b2, w3, b3, lw1, lb1, lw2, lb2) = params
    n, f_in = x.shape
    n_graphs = pool.shape[0]
    n_classes = lw2.shape[1]

    # Padding decoupled from tile size: pad N to a small fixed multiple, then
    # pick the largest tiles that divide the padded extent.
    n_pad = _round_up(n, PAD_MULT)
    f_pad = _round_up(f_in, LANE)
    row_tile = _pick_row_tile(n_pad)
    k_tile = _pick_k_tile(n_pad)

    bf16, f32 = jnp.bfloat16, jnp.float32

    # bf16 MXU inputs, zero-padded to lane-dense / tile-aligned shapes.
    # Padded node rows/cols are all-zero in Â and in the pooling matrix, so
    # they never contribute to real outputs.
    adj_p = _pad2(adj_norm, n_pad, n_pad, bf16)
    x_p = _pad2(x, n_pad, f_pad, bf16)
    pool_p = _pad2(pool, n_graphs, n_pad, bf16)

    w1_p = _pad2(w1, f_pad, LANE, bf16)
    w2_p = _pad2(w2, LANE, LANE, bf16)
    w3_p = _pad2(w3, LANE, LANE, bf16)
    b1_p = _pad2(b1.reshape(1, -1), 1, LANE, f32)
    b2_p = _pad2(b2.reshape(1, -1), 1, LANE, f32)
    b3_p = _pad2(b3.reshape(1, -1), 1, LANE, f32)
    lw1_p = _pad2(lw1, LANE, LANE, f32)
    lb1_p = _pad2(lb1.reshape(1, -1), 1, LANE, f32)
    lw2_p = _pad2(lw2, LANE, LANE, f32)
    lb2_p = _pad2(lb2.reshape(1, -1), 1, LANE, f32)

    # conv1: XW2 = relu(Â (X @ W1) + b1) @ W2   (X@W1 recomputed in-kernel, never hits HBM)
    xw2 = _propagate_first(adj_p, x_p, w1_p, b1_p, w2_p,
                           row_tile=row_tile, k_tile=k_tile)
    # conv2 propagate + relu, fused with conv3 transform: XW3 = relu(Â XW2 + b2) @ W3
    xw3 = _propagate(adj_p, xw2, b2_p, w3_p, row_tile=row_tile, k_tile=k_tile)
    # conv3 propagate (no relu): H3 = Â XW3 + b3
    h3 = _propagate(adj_p, xw3, b3_p, None, row_tile=row_tile, k_tile=k_tile)
    # global_add_pool + Linear/relu + Linear + log_softmax(dim=0)
    out_pad = _epilogue(pool_p, h3, lw1_p, lb1_p, lw2_p, lb2_p, k_tile=k_tile)
    return out_pad[:, :n_classes]


# ---------------------------------------------------------------------------
# Glue (plain JAX): GCN normalized adjacency and pooling matrix.
# Build/cast these once outside the hot path for large graphs.
# ---------------------------------------------------------------------------
def gcn_norm_adj(edge_index, num_nodes):
    """Â = D^-1/2 (A + I) D^-1/2 (assumes undirected/bidirectional edge_index)."""
    src, dst = edge_index[0], edge_index[1]
    loop = jnp.arange(num_nodes, dtype=src.dtype)
    src = jnp.concatenate([src, loop])
    dst = jnp.concatenate([dst, loop])
    a = jnp.zeros((num_nodes, num_nodes), jnp.float32).at[dst, src].add(1.0)
    deg = a.sum(axis=1)                                  # degree incl. self-loop
    dinv = jnp.where(deg > 0, jax.lax.rsqrt(deg), 0.0)
    return dinv[:, None] * a * dinv[None, :]


def pooling_matrix(batch, num_graphs):
    """P[g, n] = 1 iff node n belongs to graph g (global_add_pool as matmul)."""
    return (batch[None, :] == jnp.arange(num_graphs)[:, None]).astype(jnp.float32)


# ---------------------------------------------------------------------------
# Deterministic parameter init (shapes follow the module's __init__)
# ---------------------------------------------------------------------------
def init_params(key, num_node_features, num_classes):
    ks = jax.random.split(key, 10)

    def glorot(k, shape):
        lim = (6.0 / (shape[0] + shape[1])) ** 0.5
        return jax.random.uniform(k, shape, jnp.float32, -lim, lim)

    w1 = glorot(ks[0], (num_node_features, 32)); b1 = jnp.zeros((32,), jnp.float32)
    w2 = glorot(ks[1], (32, 64));                b2 = jnp.zeros((64,), jnp.float32)
    w3 = glorot(ks[2], (64, 64));                b3 = jnp.zeros((64,), jnp.float32)
    lw1 = glorot(ks[3], (64, 32))
    lb1 = jax.random.uniform(ks[4], (32,), jnp.float32, -0.05, 0.05)
    lw2 = glorot(ks[5], (32, num_classes))
    lb2 = jax.random.uniform(ks[6], (num_classes,), jnp.float32, -0.05, 0.05)
    return (w1, b1, w2, b2, w3, b3, lw1, lb1, lw2, lb2)


# ---------------------------------------------------------------------------
if __name__ == "__main__":
    NUM_NODE_FEATURES = 4
    NUM_CLASSES = 4
    NODES_PER_GRAPH = 8
    NUM_GRAPHS = 2
    N = NODES_PER_GRAPH * NUM_GRAPHS  # 16 nodes total

    key = jax.random.PRNGKey(0)
    k_x, k_p = jax.random.split(key)

    # node features
    x = jax.random.normal(k_x, (N, NUM_NODE_FEATURES), jnp.float32)

    # edge_index: a bidirectional ring inside each graph (deterministic)
    srcs, dsts = [], []
    for g in range(NUM_GRAPHS):
        base = g * NODES_PER_GRAPH
        for i in range(NODES_PER_GRAPH):
            a = base + i
            b = base + (i + 1) % NODES_PER_GRAPH
            srcs += [a, b]
            dsts += [b, a]
    edge_index = jnp.array([srcs, dsts], dtype=jnp.int32)

    # batch assignment for global_add_pool
    batch = jnp.repeat(jnp.arange(NUM_GRAPHS, dtype=jnp.int32), NODES_PER_GRAPH)

    adj_norm = gcn_norm_adj(edge_index, N)
    pool = pooling_matrix(batch, NUM_GRAPHS)
    params = init_params(k_p, NUM_NODE_FEATURES, NUM_CLASSES)

    fwd = jax.jit(gcn_forward)
    out = fwd(adj_norm, x, params, pool)
    out = jax.block_until_ready(out)

    assert out.shape == (NUM_GRAPHS, NUM_CLASSES)
    assert bool(jnp.all(jnp.isfinite(out)))
    # sanity: log_softmax over dim=0 -> each column's exp sums to 1
    col_sums = jnp.exp(out).sum(axis=0)
    assert bool(jnp.allclose(col_sums, 1.0, atol=1e-5))

    print("KERNEL_OK")
</pallas_src>

<mosaic_0001>
module attributes {stable_mosaic.version = 11 : i64} {
  func.func @_prop_first_kernel(%arg0: i32, %arg1: i32, %arg2: memref<128x256xbf16, #tpu.memory_space<vmem>>, %arg3: memref<256x128xbf16, #tpu.memory_space<vmem>>, %arg4: memref<128x128xbf16, #tpu.memory_space<vmem>>, %arg5: memref<1x128xf32, #tpu.memory_space<vmem>>, %arg6: memref<128x128xbf16, #tpu.memory_space<vmem>>, %arg7: memref<128x128xbf16, #tpu.memory_space<vmem>>, %arg8: memref<128x128xf32, #tpu.memory_space<vmem>>) attributes {dimension_semantics = [#tpu.dimension_semantics<parallel>, #tpu.dimension_semantics<arbitrary>], iteration_bounds = array<i64: 2, 1>, scalar_prefetch = 0 : i64, scratch_operands = 1 : i64, tpu.core_type = #tpu.core_type<tc>, window_params = [{transform_indices = @transform_0, window_bounds = array<i64: 128, 256>}, {transform_indices = @transform_1, window_bounds = array<i64: 256, 128>}, {pipeline_mode = #tpu.pipeline_mode<synchronous>, transform_indices = @transform_2, window_bounds = array<i64: 128, 128>}, {pipeline_mode = #tpu.pipeline_mode<synchronous>, transform_indices = @transform_3, window_bounds = array<i64: 1, 128>}, {pipeline_mode = #tpu.pipeline_mode<synchronous>, transform_indices = @transform_4, window_bounds = array<i64: 128, 128>}, {transform_indices = @transform_5, window_bounds = array<i64: 128, 128>}]} {
    %c0 = arith.constant 0 : index
    %c0_0 = arith.constant 0 : index
    %0 = vector.load %arg3[%c0, %c0_0] : memref<256x128xbf16, #tpu.memory_space<vmem>>, vector<256x128xbf16>
    %c0_1 = arith.constant 0 : index
    %c0_2 = arith.constant 0 : index
    %1 = vector.load %arg4[%c0_1, %c0_2] : memref<128x128xbf16, #tpu.memory_space<vmem>>, vector<128x128xbf16>
    %cst = arith.constant dense<0.000000e+00> : vector<256x128xf32>
    %2 = tpu.matmul %0, %1, %cst {dimension_numbers = #tpu.dot_dimension_numbers<[1], [0], [0], [1], [0, 0, 1, 1], [], []>} : vector<256x128xbf16>, vector<128x128xbf16>, vector<256x128xf32> -> vector<256x128xf32>
    %3 = arith.truncf %2 : vector<256x128xf32> to vector<256x128xbf16>
    %c0_3 = arith.constant 0 : index
    %c0_4 = arith.constant 0 : index
    %4 = vector.load %arg2[%c0_3, %c0_4] : memref<128x256xbf16, #tpu.memory_space<vmem>>, vector<128x256xbf16>
    %cst_5 = arith.constant dense<0.000000e+00> : vector<128x128xf32>
    %5 = tpu.matmul %4, %3, %cst_5 {dimension_numbers = #tpu.dot_dimension_numbers<[1], [0], [0], [1], [0, 0, 1, 1], [], []>} : vector<128x256xbf16>, vector<256x128xbf16>, vector<128x128xf32> -> vector<128x128xf32>
    %c0_i32 = arith.constant 0 : i32
    %6 = arith.cmpi eq, %arg1, %c0_i32 : i32
    %7 = arith.extui %6 : i1 to i32
    %c0_i32_6 = arith.constant 0 : i32
    %8 = arith.cmpi ne, %7, %c0_i32_6 : i32
    scf.if %8 {
      %c0_11 = arith.constant 0 : index
      %c0_12 = arith.constant 0 : index
      %15 = vector.load %arg8[%c0_11, %c0_12] : memref<128x128xf32, #tpu.memory_space<vmem>>, vector<128x128xf32>
      tpu.vector_store %arg8[%c0_11, %c0_12], %5 {strides = array<i32>} : memref<128x128xf32, #tpu.memory_space<vmem>>, vector<128x128xf32>,
    } else {
    }
    %c0_i32_7 = arith.constant 0 : i32
    %9 = arith.cmpi ne, %arg1, %c0_i32_7 : i32
    %10 = arith.extui %9 : i1 to i32
    %c0_i32_8 = arith.constant 0 : i32
    %11 = arith.cmpi ne, %10, %c0_i32_8 : i32
    scf.if %11 {
      %c0_11 = arith.constant 0 : index
      %c0_12 = arith.constant 0 : index
      %15 = vector.load %arg8[%c0_11, %c0_12] : memref<128x128xf32, #tpu.memory_space<vmem>>, vector<128x128xf32>
      %16 = arith.addf %15, %5 : vector<128x128xf32>
      %c0_13 = arith.constant 0 : index
      %c0_14 = arith.constant 0 : index
      %17 = vector.load %arg8[%c0_13, %c0_14] : memref<128x128xf32, #tpu.memory_space<vmem>>, vector<128x128xf32>
      tpu.vector_store %arg8[%c0_13, %c0_14], %16 {strides = array<i32>} : memref<128x128xf32, #tpu.memory_space<vmem>>, vector<128x128xf32>,
    } else {
    }
    %c0_i32_9 = arith.constant 0 : i32
    %12 = arith.cmpi eq, %arg1, %c0_i32_9 : i32
    %13 = arith.extui %12 : i1 to i32
    %c0_i32_10 = arith.constant 0 : i32
    %14 = arith.cmpi ne, %13, %c0_i32_10 : i32
    scf.if %14 {
      %c0_11 = arith.constant 0 : index
      %c0_12 = arith.constant 0 : index
      %15 = vector.load %arg8[%c0_11, %c0_12] : memref<128x128xf32, #tpu.memory_space<vmem>>, vector<128x128xf32>
      %c0_13 = arith.constant 0 : index
      %c0_14 = arith.constant 0 : index
      %16 = vector.load %arg5[%c0_13, %c0_14] : memref<1x128xf32, #tpu.memory_space<vmem>>, vector<1x128xf32>
      %17 = vector.broadcast %16 : vector<1x128xf32> to vector<128x128xf32>
      %18 = arith.addf %15, %17 : vector<128x128xf32>
      %cst_15 = arith.constant 0.000000e+00 : f32
      %19 = vector.broadcast %cst_15 : f32 to vector<128x128xf32>
      %20 = arith.maximumf %18, %19 : vector<128x128xf32>
      %21 = arith.truncf %20 : vector<128x128xf32> to vector<128x128xbf16>
      %c0_16 = arith.constant 0 : index
      %c0_17 = arith.constant 0 : index
      %22 = vector.load %arg6[%c0_16, %c0_17] : memref<128x128xbf16, #tpu.memory_space<vmem>>, vector<128x128xbf16>
      %cst_18 = arith.constant dense<0.000000e+00> : vector<128x128xf32>
      %23 = tpu.matmul %21, %22, %cst_18 {dimension_numbers = #tpu.dot_dimension_numbers<[1], [0], [0], [1], [0, 0, 1, 1], [], []>} : vector<128x128xbf16>, vector<128x128xbf16>, vector<128x128xf32> -> vector<128x128xf32>
      %24 = arith.truncf %23 : vector<128x128xf32> to vector<128x128xbf16>
      %c0_19 = arith.constant 0 : index
      %c0_20 = arith.constant 0 : index
      %25 = vector.load %arg7[%c0_19, %c0_20] : memref<128x128xbf16, #tpu.memory_space<vmem>>, vector<128x128xbf16>
      tpu.vector_store %arg7[%c0_19, %c0_20], %24 {strides = array<i32>} : memref<128x128xbf16, #tpu.memory_space<vmem>>, vector<128x128xbf16>,
    } else {
    }
    return
  }
  func.func @transform_0(%arg0: i32, %arg1: i32) -> (i32, i32) {
    %c0_i32 = arith.constant 0 : i32
    return %arg0, %arg1 : i32, i32
  }
  func.func @transform_1(%arg0: i32, %arg1: i32) -> (i32, i32) {
    %c0_i32 = arith.constant 0 : i32
    %c0_i32_0 = arith.constant 0 : i32
    return %arg1, %c0_i32 : i32, i32
  }
  func.func @transform_2(%arg0: i32, %arg1: i32) -> (i32, i32) {
    %c0_i32 = arith.constant 0 : i32
    %c0_i32_0 = arith.constant 0 : i32
    %c0_i32_1 = arith.constant 0 : i32
    return %c0_i32, %c0_i32_0 : i32, i32
  }
  func.func @transform_3(%arg0: i32, %arg1: i32) -> (i32, i32) {
    %c0_i32 = arith.constant 0 : i32
    %c0_i32_0 = arith.constant 0 : i32
    %c0_i32_1 = arith.constant 0 : i32
    return %c0_i32, %c0_i32_0 : i32, i32
  }
  func.func @transform_4(%arg0: i32, %arg1: i32) -> (i32, i32) {
    %c0_i32 = arith.constant 0 : i32
    %c0_i32_0 = arith.constant 0 : i32
    %c0_i32_1 = arith.constant 0 : i32
    return %c0_i32, %c0_i32_0 : i32, i32
  }
  func.func @transform_5(%arg0: i32, %arg1: i32) -> (i32, i32) {
    %c0_i32 = arith.constant 0 : i32
    %c0_i32_0 = arith.constant 0 : i32
    return %arg0, %c0_i32 : i32, i32
  }
}

module attributes {stable_mosaic.version = 11 : i64} {
  func.func @_prop_last_kernel(%arg0: i32, %arg1: i32, %arg2: memref<128x256xbf16, #tpu.memory_space<vmem>>, %arg3: memref<256x128xbf16, #tpu.memory_space<vmem>>, %arg4: memref<1x128xf32, #tpu.memory_space<vmem>>, %arg5: memref<128x128xbf16, #tpu.memory_space<vmem>>, %arg6: memref<128x128xf32, #tpu.memory_space<vmem>>) attributes {dimension_semantics = [#tpu.dimension_semantics<parallel>, #tpu.dimension_semantics<arbitrary>], iteration_bounds = array<i64: 2, 1>, scalar_prefetch = 0 : i64, scratch_operands = 1 : i64, tpu.core_type = #tpu.core_type<tc>, window_params = [{transform_indices = @transform_0, window_bounds = array<i64: 128, 256>}, {transform_indices = @transform_1, window_bounds = array<i64: 256, 128>}, {pipeline_mode = #tpu.pipeline_mode<synchronous>, transform_indices = @transform_2, window_bounds = array<i64: 1, 128>}, {transform_indices = @transform_3, window_bounds = array<i64: 128, 128>}]} {
    %c0 = arith.constant 0 : index
    %c0_0 = arith.constant 0 : index
    %0 = vector.load %arg2[%c0, %c0_0] : memref<128x256xbf16, #tpu.memory_space<vmem>>, vector<128x256xbf16>
    %c0_1 = arith.constant 0 : index
    %c0_2 = arith.constant 0 : index
    %1 = vector.load %arg3[%c0_1, %c0_2] : memref<256x128xbf16, #tpu.memory_space<vmem>>, vector<256x128xbf16>
    %cst = arith.constant dense<0.000000e+00> : vector<128x128xf32>
    %2 = tpu.matmul %0, %1, %cst {dimension_numbers = #tpu.dot_dimension_numbers<[1], [0], [0], [1], [0, 0, 1, 1], [], []>} : vector<128x256xbf16>, vector<256x128xbf16>, vector<128x128xf32> -> vector<128x128xf32>
    %c0_i32 = arith.constant 0 : i32
    %3 = arith.cmpi eq, %arg1, %c0_i32 : i32
    %4 = arith.extui %3 : i1 to i32
    %c0_i32_3 = arith.constant 0 : i32
    %5 = arith.cmpi ne, %4, %c0_i32_3 : i32
    scf.if %5 {
      %c0_8 = arith.constant 0 : index
      %c0_9 = arith.constant 0 : index
      %12 = vector.load %arg6[%c0_8, %c0_9] : memref<128x128xf32, #tpu.memory_space<vmem>>, vector<128x128xf32>
      tpu.vector_store %arg6[%c0_8, %c0_9], %2 {strides = array<i32>} : memref<128x128xf32, #tpu.memory_space<vmem>>, vector<128x128xf32>,
    } else {
    }
    %c0_i32_4 = arith.constant 0 : i32
    %6 = arith.cmpi ne, %arg1, %c0_i32_4 : i32
    %7 = arith.extui %6 : i1 to i32
    %c0_i32_5 = arith.constant 0 : i32
    %8 = arith.cmpi ne, %7, %c0_i32_5 : i32
    scf.if %8 {
      %c0_8 = arith.constant 0 : index
      %c0_9 = arith.constant 0 : index
      %12 = vector.load %arg6[%c0_8, %c0_9] : memref<128x128xf32, #tpu.memory_space<vmem>>, vector<128x128xf32>
      %13 = arith.addf %12, %2 : vector<128x128xf32>
      %c0_10 = arith.constant 0 : index
      %c0_11 = arith.constant 0 : index
      %14 = vector.load %arg6[%c0_10, %c0_11] : memref<128x128xf32, #tpu.memory_space<vmem>>, vector<128x128xf32>
      tpu.vector_store %arg6[%c0_10, %c0_11], %13 {strides = array<i32>} : memref<128x128xf32, #tpu.memory_space<vmem>>, vector<128x128xf32>,
    } else {
    }
    %c0_i32_6 = arith.constant 0 : i32
    %9 = arith.cmpi eq, %arg1, %c0_i32_6 : i32
    %10 = arith.extui %9 : i1 to i32
    %c0_i32_7 = arith.constant 0 : i32
    %11 = arith.cmpi ne, %10, %c0_i32_7 : i32
    scf.if %11 {
      %c0_8 = arith.constant 0 : index
      %c0_9 = arith.constant 0 : index
      %12 = vector.load %arg6[%c0_8, %c0_9] : memref<128x128xf32, #tpu.memory_space<vmem>>, vector<128x128xf32>
      %c0_10 = arith.constant 0 : index
      %c0_11 = arith.constant 0 : index
      %13 = vector.load %arg4[%c0_10, %c0_11] : memref<1x128xf32, #tpu.memory_space<vmem>>, vector<1x128xf32>
      %14 = vector.broadcast %13 : vector<1x128xf32> to vector<128x128xf32>
      %15 = arith.addf %12, %14 : vector<128x128xf32>
      %16 = arith.truncf %15 : vector<128x128xf32> to vector<128x128xbf16>
      %c0_12 = arith.constant 0 : index
      %c0_13 = arith.constant 0 : index
      %17 = vector.load %arg5[%c0_12, %c0_13] : memref<128x128xbf16, #tpu.memory_space<vmem>>, vector<128x128xbf16>
      tpu.vector_store %arg5[%c0_12, %c0_13], %16 {strides = array<i32>} : memref<128x128xbf16, #tpu.memory_space<vmem>>, vector<128x128xbf16>,
    } else {
    }
    return
  }
  func.func @transform_0(%arg0: i32, %arg1: i32) -> (i32, i32) {
    %c0_i32 = arith.constant 0 : i32
    return %arg0, %arg1 : i32, i32
  }
  func.func @transform_1(%arg0: i32, %arg1: i32) -> (i32, i32) {
    %c0_i32 = arith.constant 0 : i32
    %c0_i32_0 = arith.constant 0 : i32
    return %arg1, %c0_i32 : i32, i32
  }
  func.func @transform_2(%arg0: i32, %arg1: i32) -> (i32, i32) {
    %c0_i32 = arith.constant 0 : i32
    %c0_i32_0 = arith.constant 0 : i32
    %c0_i32_1 = arith.constant 0 : i32
    return %c0_i32, %c0_i32_0 : i32, i32
  }
  func.func @transform_3(%arg0: i32, %arg1: i32) -> (i32, i32) {
    %c0_i32 = arith.constant 0 : i32
    %c0_i32_0 = arith.constant 0 : i32
    return %arg0, %c0_i32 : i32, i32
  }
}

module attributes {stable_mosaic.version = 11 : i64} {
  func.func @_prop_fused_kernel(%arg0: i32, %arg1: i32, %arg2: memref<128x256xbf16, #tpu.memory_space<vmem>>, %arg3: memref<256x128xbf16, #tpu.memory_space<vmem>>, %arg4: memref<1x128xf32, #tpu.memory_space<vmem>>, %arg5: memref<128x128xbf16, #tpu.memory_space<vmem>>, %arg6: memref<128x128xbf16, #tpu.memory_space<vmem>>, %arg7: memref<128x128xf32, #tpu.memory_space<vmem>>) attributes {dimension_semantics = [#tpu.dimension_semantics<parallel>, #tpu.dimension_semantics<arbitrary>], iteration_bounds = array<i64: 2, 1>, scalar_prefetch = 0 : i64, scratch_operands = 1 : i64, tpu.core_type = #tpu.core_type<tc>, window_params = [{transform_indices = @transform_0, window_bounds = array<i64: 128, 256>}, {transform_indices = @transform_1, window_bounds = array<i64: 256, 128>}, {pipeline_mode = #tpu.pipeline_mode<synchronous>, transform_indices = @transform_2, window_bounds = array<i64: 1, 128>}, {pipeline_mode = #tpu.pipeline_mode<synchronous>, transform_indices = @transform_3, window_bounds = array<i64: 128, 128>}, {transform_indices = @transform_4, window_bounds = array<i64: 128, 128>}]} {
    %c0 = arith.constant 0 : index
    %c0_0 = arith.constant 0 : index
    %0 = vector.load %arg2[%c0, %c0_0] : memref<128x256xbf16, #tpu.memory_space<vmem>>, vector<128x256xbf16>
    %c0_1 = arith.constant 0 : index
    %c0_2 = arith.constant 0 : index
    %1 = vector.load %arg3[%c0_1, %c0_2] : memref<256x128xbf16, #tpu.memory_space<vmem>>, vector<256x128xbf16>
    %cst = arith.constant dense<0.000000e+00> : vector<128x128xf32>
    %2 = tpu.matmul %0, %1, %cst {dimension_numbers = #tpu.dot_dimension_numbers<[1], [0], [0], [1], [0, 0, 1, 1], [], []>} : vector<128x256xbf16>, vector<256x128xbf16>, vector<128x128xf32> -> vector<128x128xf32>
    %c0_i32 = arith.constant 0 : i32
    %3 = arith.cmpi eq, %arg1, %c0_i32 : i32
    %4 = arith.extui %3 : i1 to i32
    %c0_i32_3 = arith.constant 0 : i32
    %5 = arith.cmpi ne, %4, %c0_i32_3 : i32
    scf.if %5 {
      %c0_8 = arith.constant 0 : index
      %c0_9 = arith.constant 0 : index
      %12 = vector.load %arg7[%c0_8, %c0_9] : memref<128x128xf32, #tpu.memory_space<vmem>>, vector<128x128xf32>
      tpu.vector_store %arg7[%c0_8, %c0_9], %2 {strides = array<i32>} : memref<128x128xf32, #tpu.memory_space<vmem>>, vector<128x128xf32>,
    } else {
    }
    %c0_i32_4 = arith.constant 0 : i32
    %6 = arith.cmpi ne, %arg1, %c0_i32_4 : i32
    %7 = arith.extui %6 : i1 to i32
    %c0_i32_5 = arith.constant 0 : i32
    %8 = arith.cmpi ne, %7, %c0_i32_5 : i32
    scf.if %8 {
      %c0_8 = arith.constant 0 : index
      %c0_9 = arith.constant 0 : index
      %12 = vector.load %arg7[%c0_8, %c0_9] : memref<128x128xf32, #tpu.memory_space<vmem>>, vector<128x128xf32>
      %13 = arith.addf %12, %2 : vector<128x128xf32>
      %c0_10 = arith.constant 0 : index
      %c0_11 = arith.constant 0 : index
      %14 = vector.load %arg7[%c0_10, %c0_11] : memref<128x128xf32, #tpu.memory_space<vmem>>, vector<128x128xf32>
      tpu.vector_store %arg7[%c0_10, %c0_11], %13 {strides = array<i32>} : memref<128x128xf32, #tpu.memory_space<vmem>>, vector<128x128xf32>,
    } else {
    }
    %c0_i32_6 = arith.constant 0 : i32
    %9 = arith.cmpi eq, %arg1, %c0_i32_6 : i32
    %10 = arith.extui %9 : i1 to i32
    %c0_i32_7 = arith.constant 0 : i32
    %11 = arith.cmpi ne, %10, %c0_i32_7 : i32
    scf.if %11 {
      %c0_8 = arith.constant 0 : index
      %c0_9 = arith.constant 0 : index
      %12 = vector.load %arg7[%c0_8, %c0_9] : memref<128x128xf32, #tpu.memory_space<vmem>>, vector<128x128xf32>
      %c0_10 = arith.constant 0 : index
      %c0_11 = arith.constant 0 : index
      %13 = vector.load %arg4[%c0_10, %c0_11] : memref<1x128xf32, #tpu.memory_space<vmem>>, vector<1x128xf32>
      %14 = vector.broadcast %13 : vector<1x128xf32> to vector<128x128xf32>
      %15 = arith.addf %12, %14 : vector<128x128xf32>
      %cst_12 = arith.constant 0.000000e+00 : f32
      %16 = vector.broadcast %cst_12 : f32 to vector<128x128xf32>
      %17 = arith.maximumf %15, %16 : vector<128x128xf32>
      %18 = arith.truncf %17 : vector<128x128xf32> to vector<128x128xbf16>
      %c0_13 = arith.constant 0 : index
      %c0_14 = arith.constant 0 : index
      %19 = vector.load %arg5[%c0_13, %c0_14] : memref<128x128xbf16, #tpu.memory_space<vmem>>, vector<128x128xbf16>
      %cst_15 = arith.constant dense<0.000000e+00> : vector<128x128xf32>
      %20 = tpu.matmul %18, %19, %cst_15 {dimension_numbers = #tpu.dot_dimension_numbers<[1], [0], [0], [1], [0, 0, 1, 1], [], []>} : vector<128x128xbf16>, vector<128x128xbf16>, vector<128x128xf32> -> vector<128x128xf32>
      %21 = arith.truncf %20 : vector<128x128xf32> to vector<128x128xbf16>
      %c0_16 = arith.constant 0 : index
      %c0_17 = arith.constant 0 : index
      %22 = vector.load %arg6[%c0_16, %c0_17] : memref<128x128xbf16, #tpu.memory_space<vmem>>, vector<128x128xbf16>
      tpu.vector_store %arg6[%c0_16, %c0_17], %21 {strides = array<i32>} : memref<128x128xbf16, #tpu.memory_space<vmem>>, vector<128x128xbf16>,
    } else {
    }
    return
  }
  func.func @transform_0(%arg0: i32, %arg1: i32) -> (i32, i32) {
    %c0_i32 = arith.constant 0 : i32
    return %arg0, %arg1 : i32, i32
  }
  func.func @transform_1(%arg0: i32, %arg1: i32) -> (i32, i32) {
    %c0_i32 = arith.constant 0 : i32
    %c0_i32_0 = arith.constant 0 : i32
    return %arg1, %c0_i32 : i32, i32
  }
  func.func @transform_2(%arg0: i32, %arg1: i32) -> (i32, i32) {
    %c0_i32 = arith.constant 0 : i32
    %c0_i32_0 = arith.constant 0 : i32
    %c0_i32_1 = arith.constant 0 : i32
    return %c0_i32, %c0_i32_0 : i32, i32
  }
  func.func @transform_3(%arg0: i32, %arg1: i32) -> (i32, i32) {
    %c0_i32 = arith.constant 0 : i32
    %c0_i32_0 = arith.constant 0 : i32
    %c0_i32_1 = arith.constant 0 : i32
    return %c0_i32, %c0_i32_0 : i32, i32
  }
  func.func @transform_4(%arg0: i32, %arg1: i32) -> (i32, i32) {
    %c0_i32 = arith.constant 0 : i32
    %c0_i32_0 = arith.constant 0 : i32
    return %arg0, %c0_i32 : i32, i32
  }
}

module attributes {stable_mosaic.version = 11 : i64} {
  func.func @_epilogue_kernel(%arg0: i32, %arg1: memref<2x256xbf16, #tpu.memory_space<vmem>>, %arg2: memref<256x128xbf16, #tpu.memory_space<vmem>>, %arg3: memref<128x128xf32, #tpu.memory_space<vmem>>, %arg4: memref<1x128xf32, #tpu.memory_space<vmem>>, %arg5: memref<128x128xf32, #tpu.memory_space<vmem>>, %arg6: memref<1x128xf32, #tpu.memory_space<vmem>>, %arg7: memref<2x128xf32, #tpu.memory_space<vmem>>, %arg8: memref<2x128xf32, #tpu.memory_space<vmem>>) attributes {dimension_semantics = [#tpu.dimension_semantics<arbitrary>], iteration_bounds = array<i64: 1>, scalar_prefetch = 0 : i64, scratch_operands = 1 : i64, tpu.core_type = #tpu.core_type<tc>, window_params = [{transform_indices = @transform_0, window_bounds = array<i64: 2, 256>}, {transform_indices = @transform_1, window_bounds = array<i64: 256, 128>}, {pipeline_mode = #tpu.pipeline_mode<synchronous>, transform_indices = @transform_2, window_bounds = array<i64: 128, 128>}, {pipeline_mode = #tpu.pipeline_mode<synchronous>, transform_indices = @transform_3, window_bounds = array<i64: 1, 128>}, {pipeline_mode = #tpu.pipeline_mode<synchronous>, transform_indices = @transform_4, window_bounds = array<i64: 128, 128>}, {pipeline_mode = #tpu.pipeline_mode<synchronous>, transform_indices = @transform_5, window_bounds = array<i64: 1, 128>}, {pipeline_mode = #tpu.pipeline_mode<synchronous>, transform_indices = @transform_6, window_bounds = array<i64: 2, 128>}]} {
    %c0 = arith.constant 0 : index
    %c0_0 = arith.constant 0 : index
    %0 = vector.load %arg1[%c0, %c0_0] : memref<2x256xbf16, #tpu.memory_space<vmem>>, vector<2x256xbf16>
    %c0_1 = arith.constant 0 : index
    %c0_2 = arith.constant 0 : index
    %1 = vector.load %arg2[%c0_1, %c0_2] : memref<256x128xbf16, #tpu.memory_space<vmem>>, vector<256x128xbf16>
    %cst = arith.constant dense<0.000000e+00> : vector<2x128xf32>
    %2 = tpu.matmul %0, %1, %cst {dimension_numbers = #tpu.dot_dimension_numbers<[1], [0], [0], [1], [0, 0, 1, 1], [], []>} : vector<2x256xbf16>, vector<256x128xbf16>, vector<2x128xf32> -> vector<2x128xf32>
    %c0_i32 = arith.constant 0 : i32
    %3 = arith.cmpi eq, %arg0, %c0_i32 : i32
    %4 = arith.extui %3 : i1 to i32
    %c0_i32_3 = arith.constant 0 : i32
    %5 = arith.cmpi ne, %4, %c0_i32_3 : i32
    scf.if %5 {
      %c0_8 = arith.constant 0 : index
      %c0_9 = arith.constant 0 : index
      %12 = vector.load %arg8[%c0_8, %c0_9] : memref<2x128xf32, #tpu.memory_space<vmem>>, vector<2x128xf32>
      tpu.vector_store %arg8[%c0_8, %c0_9], %2 {strides = array<i32>} : memref<2x128xf32, #tpu.memory_space<vmem>>, vector<2x128xf32>,
    } else {
    }
    %c0_i32_4 = arith.constant 0 : i32
    %6 = arith.cmpi ne, %arg0, %c0_i32_4 : i32
    %7 = arith.extui %6 : i1 to i32
    %c0_i32_5 = arith.constant 0 : i32
    %8 = arith.cmpi ne, %7, %c0_i32_5 : i32
    scf.if %8 {
      %c0_8 = arith.constant 0 : index
      %c0_9 = arith.constant 0 : index
      %12 = vector.load %arg8[%c0_8, %c0_9] : memref<2x128xf32, #tpu.memory_space<vmem>>, vector<2x128xf32>
      %13 = arith.addf %12, %2 : vector<2x128xf32>
      %c0_10 = arith.constant 0 : index
      %c0_11 = arith.constant 0 : index
      %14 = vector.load %arg8[%c0_10, %c0_11] : memref<2x128xf32, #tpu.memory_space<vmem>>, vector<2x128xf32>
      tpu.vector_store %arg8[%c0_10, %c0_11], %13 {strides = array<i32>} : memref<2x128xf32, #tpu.memory_space<vmem>>, vector<2x128xf32>,
    } else {
    }
    %c0_i32_6 = arith.constant 0 : i32
    %9 = arith.cmpi eq, %arg0, %c0_i32_6 : i32
    %10 = arith.extui %9 : i1 to i32
    %c0_i32_7 = arith.constant 0 : i32
    %11 = arith.cmpi ne, %10, %c0_i32_7 : i32
    scf.if %11 {
      %c0_8 = arith.constant 0 : index
      %c0_9 = arith.constant 0 : index
      %12 = vector.load %arg8[%c0_8, %c0_9] : memref<2x128xf32, #tpu.memory_space<vmem>>, vector<2x128xf32>
      %c0_10 = arith.constant 0 : index
      %c0_11 = arith.constant 0 : index
      %13 = vector.load %arg3[%c0_10, %c0_11] : memref<128x128xf32, #tpu.memory_space<vmem>>, vector<128x128xf32>
      %cst_12 = arith.constant dense<0.000000e+00> : vector<2x128xf32>
      %14 = tpu.matmul %12, %13, %cst_12 {dimension_numbers = #tpu.dot_dimension_numbers<[1], [0], [0], [1], [0, 0, 1, 1], [], []>} : vector<2x128xf32>, vector<128x128xf32>, vector<2x128xf32> -> vector<2x128xf32>
      %c0_13 = arith.constant 0 : index
      %c0_14 = arith.constant 0 : index
      %15 = vector.load %arg4[%c0_13, %c0_14] : memref<1x128xf32, #tpu.memory_space<vmem>>, vector<1x128xf32>
      %16 = vector.broadcast %15 : vector<1x128xf32> to vector<2x128xf32>
      %17 = arith.addf %14, %16 : vector<2x128xf32>
      %cst_15 = arith.constant 0.000000e+00 : f32
      %18 = vector.broadcast %cst_15 : f32 to vector<2x128xf32>
      %19 = arith.maximumf %17, %18 : vector<2x128xf32>
      %c0_16 = arith.constant 0 : index
      %c0_17 = arith.constant 0 : index
      %20 = vector.load %arg5[%c0_16, %c0_17] : memref<128x128xf32, #tpu.memory_space<vmem>>, vector<128x128xf32>
      %cst_18 = arith.constant dense<0.000000e+00> : vector<2x128xf32>
      %21 = tpu.matmul %19, %20, %cst_18 {dimension_numbers = #tpu.dot_dimension_numbers<[1], [0], [0], [1], [0, 0, 1, 1], [], []>} : vector<2x128xf32>, vector<128x128xf32>, vector<2x128xf32> -> vector<2x128xf32>
      %c0_19 = arith.constant 0 : index
      %c0_20 = arith.constant 0 : index
      %22 = vector.load %arg6[%c0_19, %c0_20] : memref<1x128xf32, #tpu.memory_space<vmem>>, vector<1x128xf32>
      %23 = vector.broadcast %22 : vector<1x128xf32> to vector<2x128xf32>
      %24 = arith.addf %21, %23 : vector<2x128xf32>
      %cst_21 = arith.constant dense<0xFF800000> : vector<128xf32>
      %25 = vector.multi_reduction <maximumf>, %24, %cst_21 [0] : vector<2x128xf32> to vector<128xf32>
      %26 = vector.shape_cast %25 : vector<128xf32> to vector<1x128xf32>
      %27 = vector.broadcast %26 : vector<1x128xf32> to vector<2x128xf32>
      %28 = arith.subf %24, %27 : vector<2x128xf32>
      %29 = math.exp %28 : vector<2x128xf32>
      %cst_22 = arith.constant dense<0.000000e+00> : vector<128xf32>
      %30 = vector.multi_reduction <add>, %29, %cst_22 [0] : vector<2x128xf32> to vector<128xf32>
      %31 = vector.shape_cast %30 : vector<128xf32> to vector<1x128xf32>
      %32 = math.log %31 : vector<1x128xf32>
      %33 = vector.broadcast %32 : vector<1x128xf32> to vector<2x128xf32>
      %34 = arith.subf %28, %33 : vector<2x128xf32>
      %c0_23 = arith.constant 0 : index
      %c0_24 = arith.constant 0 : index
      %35 = vector.load %arg7[%c0_23, %c0_24] : memref<2x128xf32, #tpu.memory_space<vmem>>, vector<2x128xf32>
      tpu.vector_store %arg7[%c0_23, %c0_24], %34 {strides = array<i32>} : memref<2x128xf32, #tpu.memory_space<vmem>>, vector<2x128xf32>,
    } else {
    }
    return
  }
  func.func @transform_0(%arg0: i32) -> (i32, i32) {
    %c0_i32 = arith.constant 0 : i32
    %c0_i32_0 = arith.constant 0 : i32
    return %c0_i32, %arg0 : i32, i32
  }
  func.func @transform_1(%arg0: i32) -> (i32, i32) {
    %c0_i32 = arith.constant 0 : i32
    %c0_i32_0 = arith.constant 0 : i32
    return %arg0, %c0_i32 : i32, i32
  }
  func.func @transform_2(%arg0: i32) -> (i32, i32) {
    %c0_i32 = arith.constant 0 : i32
    %c0_i32_0 = arith.constant 0 : i32
    %c0_i32_1 = arith.constant 0 : i32
    return %c0_i32, %c0_i32_0 : i32, i32
  }
  func.func @transform_3(%arg0: i32) -> (i32, i32) {
    %c0_i32 = arith.constant 0 : i32
    %c0_i32_0 = arith.constant 0 : i32
    %c0_i32_1 = arith.constant 0 : i32
    return %c0_i32, %c0_i32_0 : i32, i32
  }
  func.func @transform_4(%arg0: i32) -> (i32, i32) {
    %c0_i32 = arith.constant 0 : i32
    %c0_i32_0 = arith.constant 0 : i32
    %c0_i32_1 = arith.constant 0 : i32
    return %c0_i32, %c0_i32_0 : i32, i32
  }
  func.func @transform_5(%arg0: i32) -> (i32, i32) {
    %c0_i32 = arith.constant 0 : i32
    %c0_i32_0 = arith.constant 0 : i32
    %c0_i32_1 = arith.constant 0 : i32
    return %c0_i32, %c0_i32_0 : i32, i32
  }
  func.func @transform_6(%arg0: i32) -> (i32, i32) {
    %c0_i32 = arith.constant 0 : i32
    %c0_i32_0 = arith.constant 0 : i32
    %c0_i32_1 = arith.constant 0 : i32
    return %c0_i32, %c0_i32_0 : i32, i32
  }
}

</mosaic_0001>

<bundles_post_ra>
// kernel: gcn_forward.6
= control target key start
LH: loop header
LB: loop body
LE: loop exit
PB: predicated region body
PF: predicated region fallthrough
CT: control target
= control target key end

     0   :  { %s1084_s12 = smov 0   ;;  %s1086_s13 = smov 0   ;;  %s1237_s0 = inlined_call_operand.vmem [shape: bf16[256,256], index: 0, kind: input, shape index: {}]   ;;  %s1238_s1 = inlined_call_operand.vmem [shape: bf16[256,128], index: 1, kind: input, shape index: {}]   ;;  %s1239_s2 = inlined_call_operand.vmem [shape: f32[1,128], index: 2, kind: input, shape index: {}]   ;;  %s1240_s3 = inlined_call_operand.vmem [shape: bf16[256,128], index: 3, kind: output, shape index: {}]  }
   0x1   :  { %s1088_s14 = smov 0  }
   0x2 LB: > { %s25_s15 = sadd.s32 1, %s1058_s13  ;;  %p783_p0 = scmp.ge.s32.totalorder %s1062_s14, 1  ;;  %s1062_s14 = sphi %s1088_s14, %s13_s14   ;;  %s1058_s13 = sphi %s1086_s13, %s1242_s13   ;;  %s1054_s12 = sphi %s1084_s12, %s1241_s12  }
   0x3   : > { %p27_p1 = scmp.ge.s32.totalorder %s25_s15, 2  ;;  %p169_p2 = scmp.lt.s32.totalorder %s1062_s14, 3 }
   0x5   : > { %s1244_s15 = smov (%p27_p1, %s25_s15), 0  ;;  %p170_p3 = pnand %p783_p0, %p169_p2 }
   0x6   : > { %s784_s28 = sshll.u32 (!%p170_p3), %s1054_s12, 4 }
   0x7   : > { %173 = sbr.rel (%p170_p3) target bundleno = 240 (0xf0), region = 32  ;;  %p205_p4 = scmp.lt.s32.totalorder (!%p170_p3), %s784_s28, 31 }
   0xc   : > { %v943_v0 = vld [vmem:[%s1238_s1 + $0x38] sm:$0xff]  ;;  %v942_v2 = vld [vmem:[%s1238_s1 + $0x30] sm:$0xff]  ;;  %v941_v4 = vld [vmem:[%s1238_s1 + $0x28] sm:$0xff]  ;;  %s1246_s28 = smov (!%p205_p4, %s784_s28), 31 }
   0xd   : > { %v951_v1 = vld [vmem:[%s1238_s1 + $0x78] sm:$0xff]  ;;  %451 = vmatpush.bf16.msra.mxu0 %v943_v0  ;;  %999 = vmatpush.bf16.msra.mxu2 %v943_v0  ;;  %v950_v3 = vld [vmem:[%s1238_s1 + $0x70] sm:$0xff]  ;;  %v949_v5 = vld [vmem:[%s1238_s1 + $0x68] sm:$0xff]  ;;  %s919_s17 = sshll.u32 %s1246_s28, 3  ;;  %s788_s5 = sshll.u32 %s1246_s28, 2 }
   0xe   : > { %500 = vmatpush.bf16.msra.mxu1 %v951_v1  ;;  %1007 = vmatpush.bf16.msra.mxu3 %v951_v1  ;;  %v940_v6 = vld [vmem:[%s1238_s1 + $0x20] sm:$0xff]  ;;  %v939_v8 = vld [vmem:[%s1238_s1 + $0x18] sm:$0xff]  ;;  %v938_v10 = vld [vmem:[%s1238_s1 + $0x10] sm:$0xff]  ;;  %s1150_s22 = scalar_lea.vmem %s1237_s0, %s919_s17  ;;  %s1204_s8 = scalar_lea.vmem %s1240_s3, %s788_s5 }
   0xf   : > { %v948_v7 = vld [vmem:[%s1238_s1 + $0x60] sm:$0xff]  ;;  %v947_v9 = vld [vmem:[%s1238_s1 + $0x58] sm:$0xff]  ;;  %v946_v11 = vld [vmem:[%s1238_s1 + $0x50] sm:$0xff] }
  0x10   : > { %v937_v12 = vld [vmem:[%s1238_s1 + $0x8] sm:$0xff]  ;;  %v936_v14 = vld [vmem:[%s1238_s1] sm:$0xff]  ;;  %v799_v28 = vld [vmem:[%s1150_s22 + $0x10] sm:$0xf] }
  0x11   : > { %452 = vmatpush.bf16.msra.mxu0 %v942_v2  ;;  %1000 = vmatpush.bf16.msra.mxu2 %v942_v2  ;;  %v945_v13 = vld [vmem:[%s1238_s1 + $0x48] sm:$0xff]  ;;  %v944_v15 = vld [vmem:[%s1238_s1 + $0x40] sm:$0xff]  ;;  %v923_v29 = vld [vmem:[%s1150_s22 + $0x14] sm:$0xf0] }
  0x12   : > { %501 = vmatpush.bf16.msra.mxu1 %v950_v3  ;;  %1008 = vmatpush.bf16.msra.mxu3 %v950_v3  ;;  %v791_v16 = vld [vmem:[%s1150_s22] sm:$0xf]  ;;  %v921_v17 = vld [vmem:[%s1150_s22 + $0x4] sm:$0xf0]  ;;  %v920_v20 = vld [vmem:[%s1150_s22 + $0x4] sm:$0xf]  ;;  %v800_v36 = vor.u32 %v923_v29, %v799_v28 }
  0x13   : > { %v823_v18 = vld [vmem:[%s1150_s22 + $0x40] sm:$0xf]  ;;  %v929_v19 = vld [vmem:[%s1150_s22 + $0x44] sm:$0xf0]  ;;  %v793_v21 = vld [vmem:[%s1150_s22 + $0x8] sm:$0xf0]  ;;  %v792_v24 = vor.u32 %v921_v17, %v791_v16 }
  0x14   : > { %v928_v22 = vld [vmem:[%s1150_s22 + $0x44] sm:$0xf]  ;;  %v825_v23 = vld [vmem:[%s1150_s22 + $0x48] sm:$0xf0]  ;;  %v824_v25 = vor.u32 %v929_v19, %v823_v18  ;;  %v796_v26 = vor.u32 %v920_v20, %v793_v21  ;;  %v831_v30 = vld [vmem:[%s1150_s22 + $0x50] sm:$0xf] }
  0x15   : > { %453 = vmatpush.bf16.msra.mxu0 %v941_v4  ;;  %1001 = vmatpush.bf16.msra.mxu2 %v941_v4  ;;  %v828_v27 = vor.u32 %v928_v22, %v825_v23  ;;  %v931_v31 = vld [vmem:[%s1150_s22 + $0x54] sm:$0xf0]  ;;  %v922_v32 = vld [vmem:[%s1150_s22 + $0x14] sm:$0xf]  ;;  %v801_v33 = vld [vmem:[%s1150_s22 + $0x18] sm:$0xf0] }
  0x16   : > { %502 = vmatpush.bf16.msra.mxu1 %v949_v5  ;;  %1009 = vmatpush.bf16.msra.mxu3 %v949_v5  ;;  %v930_v34 = vld [vmem:[%s1150_s22 + $0x54] sm:$0xf]  ;;  %v833_v35 = vld [vmem:[%s1150_s22 + $0x58] sm:$0xf0]  ;;  %v832_v37 = vor.u32 %v931_v31, %v831_v30  ;;  %v804_v38 = vor.u32 %v922_v32, %v801_v33  ;;  %v807_v40 = vld [vmem:[%s1150_s22 + $0x20] sm:$0xf] }
  0x17   : > { %v836_v39 = vor.u32 %v930_v34, %v833_v35  ;;  %v925_v41 = vld [vmem:[%s1150_s22 + $0x24] sm:$0xf0]  ;;  %v839_v42 = vld [vmem:[%s1150_s22 + $0x60] sm:$0xf]  ;;  %v924_v44 = vld [vmem:[%s1150_s22 + $0x24] sm:$0xf] }
  0x18   : > { %v933_v43 = vld [vmem:[%s1150_s22 + $0x64] sm:$0xf0]  ;;  %v809_v45 = vld [vmem:[%s1150_s22 + $0x28] sm:$0xf0]  ;;  %v932_v46 = vld [vmem:[%s1150_s22 + $0x64] sm:$0xf]  ;;  %v808_v48 = vor.u32 %v925_v41, %v807_v40 }
  0x19   : > { %454 = vmatpush.bf16.msra.mxu0 %v940_v6  ;;  %1002 = vmatpush.bf16.msra.mxu2 %v940_v6  ;;  %v841_v47 = vld [vmem:[%s1150_s22 + $0x68] sm:$0xf0]  ;;  %v840_v49 = vor.u32 %v933_v43, %v839_v42  ;;  %v812_v50 = vor.u32 %v924_v44, %v809_v45  ;;  %v815_v52 = vld [vmem:[%s1150_s22 + $0x30] sm:$0xf]  ;;  %v927_v53 = vld [vmem:[%s1150_s22 + $0x34] sm:$0xf0] }
  0x1a   : > { %503 = vmatpush.bf16.msra.mxu1 %v948_v7  ;;  %1010 = vmatpush.bf16.msra.mxu3 %v948_v7  ;;  %v844_v51 = vor.u32 %v932_v46, %v841_v47  ;;  %v847_v54 = vld [vmem:[%s1150_s22 + $0x70] sm:$0xf]  ;;  %v935_v55 = vld [vmem:[%s1150_s22 + $0x74] sm:$0xf0]  ;;  %v926_v56 = vld [vmem:[%s1150_s22 + $0x34] sm:$0xf]  ;;  %v816_v60 = vor.u32 %v927_v53, %v815_v52 }
  0x1b   : > { %v817_v57 = vld [vmem:[%s1150_s22 + $0x38] sm:$0xf0]  ;;  %v934_v58 = vld [vmem:[%s1150_s22 + $0x74] sm:$0xf]  ;;  %v848_v61 = vor.u32 %v935_v55, %v847_v54  ;;  %v1196_v5 = vld [vmem:[%s1239_s2] ss:$0 sm:$0xff] }
  0x1c   : > { %v849_v59 = vld [vmem:[%s1150_s22 + $0x78] sm:$0xf0]  ;;  %v820_v62 = vor.u32 %v926_v56, %v817_v57 }
  0x1d   : > { %455 = vmatpush.bf16.msra.mxu0 %v939_v8  ;;  %1003 = vmatpush.bf16.msra.mxu2 %v939_v8  ;;  %v852_v63 = vor.u32 %v934_v58, %v849_v59 }
  0x1e   : > { %504 = vmatpush.bf16.msra.mxu1 %v947_v9  ;;  %1011 = vmatpush.bf16.msra.mxu3 %v947_v9 }
  0x21   : > { %456 = vmatpush.bf16.msra.mxu0 %v938_v10  ;;  %1004 = vmatpush.bf16.msra.mxu2 %v938_v10 }
  0x22   : > { %505 = vmatpush.bf16.msra.mxu1 %v946_v11  ;;  %1012 = vmatpush.bf16.msra.mxu3 %v946_v11 }
  0x25   : > { %457 = vmatpush.bf16.msra.mxu0 %v937_v12  ;;  %1005 = vmatpush.bf16.msra.mxu2 %v937_v12 }
  0x26   : > { %506 = vmatpush.bf16.msra.mxu1 %v945_v13  ;;  %1013 = vmatpush.bf16.msra.mxu3 %v945_v13 }
  0x29   : > { %458 = vmatpush.bf16.msra.mxu0 %v936_v14  ;;  %1006 = vmatpush.bf16.msra.mxu2 %v936_v14 }
  0x2a   : > { %507 = vmatpush.bf16.msra.mxu1 %v944_v15  ;;  %1014 = vmatpush.bf16.msra.mxu3 %v944_v15 }
  0x2c   : > { %459 = vmatmul.bf16.vlgmr.msra.gmra.mxu0 %v792_v24  ;;  %479 = vmatmul.bf16.vlgmr.msra.gmra.mxu2 %v824_v25 }
  0x2d   : > { %508 = vmatmul.bf16.vlgmr.msra.gmra.mxu1 %v796_v26  ;;  %528 = vmatmul.bf16.vlgmr.msra.gmra.mxu3 %v828_v27 }
  0x3c   : > { %464 = vmatmul.bf16.gmra.mxu0 %v800_v36  ;;  %484 = vmatmul.bf16.gmra.mxu2 %v832_v37 }
  0x3d   : > { %513 = vmatmul.bf16.gmra.mxu1 %v804_v38  ;;  %533 = vmatmul.bf16.gmra.mxu3 %v836_v39 }
  0x4c   : > { %469 = vmatmul.bf16.gmra.mxu0 %v808_v48  ;;  %489 = vmatmul.bf16.gmra.mxu2 %v840_v49 }
  0x4d   : > { %518 = vmatmul.bf16.gmra.mxu1 %v812_v50  ;;  %538 = vmatmul.bf16.gmra.mxu3 %v844_v51 }
  0x5c   : > { %474 = vmatmul.bf16.gmra.mxu0 %v816_v60  ;;  %494 = vmatmul.bf16.gmra.mxu2 %v848_v61 }
  0x5d   : > { %523 = vmatmul.bf16.gmra.mxu1 %v820_v62  ;;  %543 = vmatmul.bf16.gmra.mxu3 %v852_v63 }
  0xa9   : > { %v460_v0 = vpop.f32.mrf.mxu0 }
  0xaa   : > { %v509_v1 = vpop.f32.mrf.mxu1 }
  0xab   : > { %v510_v4 = vadd.f32 %v509_v1, %v460_v0 }
  0xad   : > { %v644_v9 = vadd.f32 %v1196_v5, %v510_v4 }
  0xaf   : > { %v480_v2 = vpop.f32.mrf.mxu2 }
  0xb0   : > { %v529_v3 = vpop.f32.mrf.mxu3 }
  0xb1   : > { %v462_v6 = vpop.f32.mrf.mxu0  ;;  %v530_v11 = vadd.f32 %v529_v3, %v480_v2 }
  0xb2   : > { %v511_v7 = vpop.f32.mrf.mxu1 }
  0xb3   : > { %v512_v8 = vadd.f32 %v511_v7, %v462_v6  ;;  %v652_v18 = vadd.f32 %v1196_v5, %v530_v11 }
  0xb5   : > { %v645_v10 = vadd.f32 %v1196_v5, %v512_v8 }
  0xb7   : > { %v955_v12 = vpack.c.bf16 %v645_v10, %v644_v9  ;;  %v482_v13 = vpop.f32.mrf.mxu2 }
  0xb8   : > { %v531_v14 = vpop.f32.mrf.mxu3 }
  0xb9   : > { %956 = vst [vmem:[%s1204_s8] sm:$0xff] %v955_v12   ;;  %v532_v15 = vadd.f32 %v531_v14, %v482_v13  ;;  %v465_v16 = vpop.f32.mrf.mxu0 }
  0xba   : > { %v514_v17 = vpop.f32.mrf.mxu1 }
  0xbb   : > { %v653_v19 = vadd.f32 %v1196_v5, %v532_v15  ;;  %v515_v23 = vadd.f32 %v514_v17, %v465_v16 }
  0xbd   : > { %v975_v20 = vpack.c.bf16 %v653_v19, %v652_v18  ;;  %v646_v27 = vadd.f32 %v1196_v5, %v515_v23 }
  0xbf   : > { %995 = vst [vmem:[%s1204_s8 + $0x20] sm:$0xff] %v975_v20   ;;  %v485_v21 = vpop.f32.mrf.mxu2 }
  0xc0   : > { %v534_v22 = vpop.f32.mrf.mxu3 }
  0xc1   : > { %v467_v24 = vpop.f32.mrf.mxu0  ;;  %v535_v29 = vadd.f32 %v534_v22, %v485_v21 }
  0xc2   : > { %v516_v25 = vpop.f32.mrf.mxu1 }
  0xc3   : > { %v517_v26 = vadd.f32 %v516_v25, %v467_v24  ;;  %v654_v36 = vadd.f32 %v1196_v5, %v535_v29 }
  0xc5   : > { %v647_v28 = vadd.f32 %v1196_v5, %v517_v26 }
  0xc7   : > { %v960_v30 = vpack.c.bf16 %v647_v28, %v646_v27  ;;  %v487_v31 = vpop.f32.mrf.mxu2 }
  0xc8   : > { %v536_v32 = vpop.f32.mrf.mxu3 }
  0xc9   : > { %992 = vst [vmem:[%s1204_s8 + $0x8] sm:$0xff] %v960_v30   ;;  %v537_v33 = vadd.f32 %v536_v32, %v487_v31  ;;  %v470_v34 = vpop.f32.mrf.mxu0 }
  0xca   : > { %v519_v35 = vpop.f32.mrf.mxu1 }
  0xcb   : > { %v655_v37 = vadd.f32 %v1196_v5, %v537_v33  ;;  %v520_v41 = vadd.f32 %v519_v35, %v470_v34 }
  0xcd   : > { %v980_v38 = vpack.c.bf16 %v655_v37, %v654_v36  ;;  %v648_v45 = vadd.f32 %v1196_v5, %v520_v41 }
  0xcf   : > { %996 = vst [vmem:[%s1204_s8 + $0x28] sm:$0xff] %v980_v38   ;;  %v490_v39 = vpop.f32.mrf.mxu2 }
  0xd0   : > { %v539_v40 = vpop.f32.mrf.mxu3 }
  0xd1   : > { %v472_v42 = vpop.f32.mrf.mxu0  ;;  %v540_v47 = vadd.f32 %v539_v40, %v490_v39 }
  0xd2   : > { %v521_v43 = vpop.f32.mrf.mxu1 }
  0xd3   : > { %v522_v44 = vadd.f32 %v521_v43, %v472_v42  ;;  %v656_v54 = vadd.f32 %v1196_v5, %v540_v47 }
  0xd5   : > { %v649_v46 = vadd.f32 %v1196_v5, %v522_v44 }
  0xd7   : > { %v965_v48 = vpack.c.bf16 %v649_v46, %v648_v45  ;;  %v492_v49 = vpop.f32.mrf.mxu2 }
  0xd8   : > { %v541_v50 = vpop.f32.mrf.mxu3 }
  0xd9   : > { %993 = vst [vmem:[%s1204_s8 + $0x10] sm:$0xff] %v965_v48   ;;  %v542_v51 = vadd.f32 %v541_v50, %v492_v49  ;;  %v475_v52 = vpop.f32.mrf.mxu0 }
  0xda   : > { %v524_v53 = vpop.f32.mrf.mxu1 }
  0xdb   : > { %v657_v55 = vadd.f32 %v1196_v5, %v542_v51  ;;  %v525_v59 = vadd.f32 %v524_v53, %v475_v52 }
  0xdd   : > { %v985_v56 = vpack.c.bf16 %v657_v55, %v656_v54  ;;  %v650_v63 = vadd.f32 %v1196_v5, %v525_v59 }
  0xdf   : > { %997 = vst [vmem:[%s1204_s8 + $0x30] sm:$0xff] %v985_v56   ;;  %v495_v57 = vpop.f32.mrf.mxu2 }
  0xe0   : > { %v544_v58 = vpop.f32.mrf.mxu3 }
  0xe1   : > { %v477_v60 = vpop.f32.mrf.mxu0  ;;  %v545_v1 = vadd.f32 %v544_v58, %v495_v57 }
  0xe2   : > { %v526_v61 = vpop.f32.mrf.mxu1 }
  0xe3   : > { %v527_v62 = vadd.f32 %v526_v61, %v477_v60  ;;  %v658_v7 = vadd.f32 %v1196_v5, %v545_v1 }
  0xe5   : > { %v651_v0 = vadd.f32 %v1196_v5, %v527_v62 }
  0xe7   : > { %v970_v2 = vpack.c.bf16 %v651_v0, %v650_v63  ;;  %v497_v3 = vpop.f32.mrf.mxu2 }
  0xe8   : > { %v546_v4 = vpop.f32.mrf.mxu3 }
  0xe9   : > { %994 = vst [vmem:[%s1204_s8 + $0x18] sm:$0xff] %v970_v2   ;;  %v547_v6 = vadd.f32 %v546_v4, %v497_v3 }
  0xeb   : > { %v659_v8 = vadd.f32 %v1196_v5, %v547_v6 }
  0xed   : > { %v990_v9 = vpack.c.bf16 %v659_v8, %v658_v7 }
  0xef   : > { %998 = vst [vmem:[%s1204_s8 + $0x38] sm:$0xff] %v990_v9  }
  0xf0 PF: > { %s13_s14 = sadd.s32 1, %s1062_s14   ;;  %s1241_s12 = smov %s1058_s13 }
  0xf1   : > { %p10_p5 = scmp.ge.s32.totalorder %s13_s14, 4   ;;  %s1242_s13 = smov %s1244_s15 }
  0xf3   :  { %12 = sbr.rel (!%p10_p5) target bundleno = 2 (0x2), region = 77 }

// kernel: gcn_forward.5
= control target key start
LH: loop header
LB: loop body
LE: loop exit
PB: predicated region body
PF: predicated region fallthrough
CT: control target
= control target key end

     0   :  { %s1301_s15 = smov 0   ;;  %s1303_s16 = smov 0   ;;  %s1478_s0 = inlined_call_operand.vmem [shape: bf16[256,256], index: 0, kind: input, shape index: {}]   ;;  %s1479_s1 = inlined_call_operand.vmem [shape: bf16[256,128], index: 1, kind: input, shape index: {}]   ;;  %s1480_s2 = inlined_call_operand.vmem [shape: f32[1,128], index: 2, kind: input, shape index: {}]   ;;  %s1481_s3 = inlined_call_operand.vmem [shape: bf16[128,128], index: 3, kind: input, shape index: {}]   ;;  %s1482_s4 = inlined_call_operand.vmem [shape: bf16[256,128], index: 4, kind: output, shape index: {}]  }
   0x1   :  { %s1305_s17 = smov 0  }
   0x2 LB: > { %s26_s18 = sadd.s32 1, %s1270_s16  ;;  %p947_p0 = scmp.ge.s32.totalorder %s1274_s17, 1  ;;  %s1274_s17 = sphi %s1305_s17, %s14_s17   ;;  %s1270_s16 = sphi %s1303_s16, %s1484_s16   ;;  %s1266_s15 = sphi %s1301_s15, %s1483_s15  }
   0x3   : > { %p28_p1 = scmp.ge.s32.totalorder %s26_s18, 2  ;;  %p194_p2 = scmp.lt.s32.totalorder %s1274_s17, 3 }
   0x5   : > { %s1486_s18 = smov (%p28_p1, %s26_s18), 0  ;;  %p195_p3 = pnand %p947_p0, %p194_p2 }
   0x6   : > { %s948_s5 = sshll.u32 (!%p195_p3), %s1266_s15, 4 }
   0x7   : > { %198 = sbr.rel (%p195_p3) target bundleno = 410 (0x19a), region = 36  ;;  %p232_p4 = scmp.lt.s32.totalorder (!%p195_p3), %s948_s5, 31 }
   0xc   : > { %v1139_v0 = vld [vmem:[%s1479_s1 + $0x38] sm:$0xff]  ;;  %v1138_v2 = vld [vmem:[%s1479_s1 + $0x30] sm:$0xff]  ;;  %v1137_v4 = vld [vmem:[%s1479_s1 + $0x28] sm:$0xff]  ;;  %s1488_s5 = smov (!%p232_p4, %s948_s5), 31 }
   0xd   : > { %v1147_v1 = vld [vmem:[%s1479_s1 + $0x78] sm:$0xff]  ;;  %478 = vmatpush.bf16.msra.mxu0 %v1139_v0  ;;  %1203 = vmatpush.bf16.msra.mxu3 %v1139_v0  ;;  %v1146_v3 = vld [vmem:[%s1479_s1 + $0x70] sm:$0xff]  ;;  %v1145_v5 = vld [vmem:[%s1479_s1 + $0x68] sm:$0xff]  ;;  %s1115_s21 = sshll.u32 %s1488_s5, 3  ;;  %s952_s29 = sshll.u32 %s1488_s5, 2 }
   0xe   : > { %527 = vmatpush.bf16.msra.mxu1 %v1147_v1  ;;  %v1136_v6 = vld [vmem:[%s1479_s1 + $0x20] sm:$0xff]  ;;  %v1135_v8 = vld [vmem:[%s1479_s1 + $0x18] sm:$0xff]  ;;  %v1134_v10 = vld [vmem:[%s1479_s1 + $0x10] sm:$0xff]  ;;  %s1367_s26 = scalar_lea.vmem %s1478_s0, %s1115_s21  ;;  %s1459_s7 = scalar_lea.vmem %s1482_s4, %s952_s29 }
   0xf   : > { %v1144_v7 = vld [vmem:[%s1479_s1 + $0x60] sm:$0xff]  ;;  %v1143_v9 = vld [vmem:[%s1479_s1 + $0x58] sm:$0xff]  ;;  %v1142_v11 = vld [vmem:[%s1479_s1 + $0x50] sm:$0xff] }
  0x10   : > { %v1133_v12 = vld [vmem:[%s1479_s1 + $0x8] sm:$0xff]  ;;  %v1132_v14 = vld [vmem:[%s1479_s1] sm:$0xff]  ;;  %v963_v25 = vld [vmem:[%s1367_s26 + $0x10] sm:$0xf] }
  0x11   : > { %479 = vmatpush.bf16.msra.mxu0 %v1138_v2  ;;  %1204 = vmatpush.bf16.msra.mxu3 %v1138_v2  ;;  %v1141_v13 = vld [vmem:[%s1479_s1 + $0x48] sm:$0xff]  ;;  %v955_v15 = vld [vmem:[%s1367_s26] sm:$0xf]  ;;  %v1116_v20 = vld [vmem:[%s1367_s26 + $0x4] sm:$0xf] }
  0x12   : > { %528 = vmatpush.bf16.msra.mxu1 %v1146_v3  ;;  %v1117_v16 = vld [vmem:[%s1367_s26 + $0x4] sm:$0xf0]  ;;  %v1003_v17 = vld [vmem:[%s1367_s26 + $0x60] sm:$0xf]  ;;  %v957_v21 = vld [vmem:[%s1367_s26 + $0x8] sm:$0xf0] }
  0x13   : > { %v1129_v18 = vld [vmem:[%s1367_s26 + $0x64] sm:$0xf0]  ;;  %v1140_v19 = vld [vmem:[%s1479_s1 + $0x40] sm:$0xff]  ;;  %v956_v22 = vor.u32 %v1117_v16, %v955_v15  ;;  %v960_v24 = vor.u32 %v1116_v20, %v957_v21  ;;  %v1119_v26 = vld [vmem:[%s1367_s26 + $0x14] sm:$0xf0] }
  0x14   : > { %v1004_v23 = vor.u32 %v1129_v18, %v1003_v17  ;;  %v1011_v27 = vld [vmem:[%s1367_s26 + $0x70] sm:$0xf]  ;;  %v1131_v28 = vld [vmem:[%s1367_s26 + $0x74] sm:$0xf0]  ;;  %v1118_v29 = vld [vmem:[%s1367_s26 + $0x14] sm:$0xf]  ;;  %v964_v31 = vor.u32 %v1119_v26, %v963_v25 }
  0x15   : > { %480 = vmatpush.bf16.msra.mxu0 %v1137_v4  ;;  %1205 = vmatpush.bf16.msra.mxu3 %v1137_v4  ;;  %v965_v30 = vld [vmem:[%s1367_s26 + $0x18] sm:$0xf0]  ;;  %v1012_v32 = vor.u32 %v1131_v28, %v1011_v27  ;;  %v971_v34 = vld [vmem:[%s1367_s26 + $0x20] sm:$0xf]  ;;  %v1121_v35 = vld [vmem:[%s1367_s26 + $0x24] sm:$0xf0] }
  0x16   : > { %529 = vmatpush.bf16.msra.mxu1 %v1145_v5  ;;  %v968_v33 = vor.u32 %v1118_v29, %v965_v30  ;;  %v1128_v36 = vld [vmem:[%s1367_s26 + $0x64] sm:$0xf]  ;;  %v1005_v37 = vld [vmem:[%s1367_s26 + $0x68] sm:$0xf0]  ;;  %v972_v40 = vor.u32 %v1121_v35, %v971_v34  ;;  %v979_v43 = vld [vmem:[%s1367_s26 + $0x30] sm:$0xf] }
  0x17   : > { %v1120_v38 = vld [vmem:[%s1367_s26 + $0x24] sm:$0xf]  ;;  %v973_v39 = vld [vmem:[%s1367_s26 + $0x28] sm:$0xf0]  ;;  %v1008_v41 = vor.u32 %v1128_v36, %v1005_v37  ;;  %v1123_v44 = vld [vmem:[%s1367_s26 + $0x34] sm:$0xf0] }
  0x18   : > { %v976_v42 = vor.u32 %v1120_v38, %v973_v39  ;;  %v1130_v45 = vld [vmem:[%s1367_s26 + $0x74] sm:$0xf]  ;;  %v1013_v46 = vld [vmem:[%s1367_s26 + $0x78] sm:$0xf0]  ;;  %v980_v49 = vor.u32 %v1123_v44, %v979_v43  ;;  %v1153_v54 = vld [vmem:[%s1481_s3 + $0x28] sm:$0xff] }
  0x19   : > { %481 = vmatpush.bf16.msra.mxu0 %v1136_v6  ;;  %1206 = vmatpush.bf16.msra.mxu3 %v1136_v6  ;;  %v1122_v47 = vld [vmem:[%s1367_s26 + $0x34] sm:$0xf]  ;;  %v981_v48 = vld [vmem:[%s1367_s26 + $0x38] sm:$0xf0]  ;;  %v1016_v50 = vor.u32 %v1130_v45, %v1013_v46  ;;  %v987_v55 = vld [vmem:[%s1367_s26 + $0x40] sm:$0xf] }
  0x1a   : > { %530 = vmatpush.bf16.msra.mxu1 %v1144_v7  ;;  %v984_v51 = vor.u32 %v1122_v47, %v981_v48  ;;  %v1155_v52 = vld [vmem:[%s1481_s3 + $0x38] sm:$0xff]  ;;  %v1154_v53 = vld [vmem:[%s1481_s3 + $0x30] sm:$0xff]  ;;  %v1125_v56 = vld [vmem:[%s1367_s26 + $0x44] sm:$0xf0] }
  0x1b   : > { %775 = vmatpush.bf16.msra.mxu2 %v1155_v52  ;;  %v1124_v57 = vld [vmem:[%s1367_s26 + $0x44] sm:$0xf]  ;;  %v989_v58 = vld [vmem:[%s1367_s26 + $0x48] sm:$0xf0]  ;;  %v988_v60 = vor.u32 %v1125_v56, %v987_v55  ;;  %v995_v62 = vld [vmem:[%s1367_s26 + $0x50] sm:$0xf] }
  0x1c   : > { %v1152_v59 = vld [vmem:[%s1481_s3 + $0x20] sm:$0xff]  ;;  %v992_v61 = vor.u32 %v1124_v57, %v989_v58  ;;  %v1127_v63 = vld [vmem:[%s1367_s26 + $0x54] sm:$0xf0]  ;;  %v1126_v0 = vld [vmem:[%s1367_s26 + $0x54] sm:$0xf] }
  0x1d   : > { %482 = vmatpush.bf16.msra.mxu0 %v1135_v8  ;;  %1207 = vmatpush.bf16.msra.mxu3 %v1135_v8  ;;  %v996_v2 = vor.u32 %v1127_v63, %v995_v62  ;;  %v1151_v4 = vld [vmem:[%s1481_s3 + $0x18] sm:$0xff]  ;;  %v1149_v6 = vld [vmem:[%s1481_s3 + $0x8] sm:$0xff] }
  0x1e   : > { %531 = vmatpush.bf16.msra.mxu1 %v1143_v9 }
  0x1f   : > { %776 = vmatpush.bf16.msra.mxu2 %v1154_v53 }
  0x21   : > { %483 = vmatpush.bf16.msra.mxu0 %v1134_v10  ;;  %1208 = vmatpush.bf16.msra.mxu3 %v1134_v10 }
  0x22   : > { %532 = vmatpush.bf16.msra.mxu1 %v1142_v11 }
  0x23   : > { %777 = vmatpush.bf16.msra.mxu2 %v1153_v54 }
  0x25   : > { %484 = vmatpush.bf16.msra.mxu0 %v1133_v12  ;;  %1209 = vmatpush.bf16.msra.mxu3 %v1133_v12 }
  0x26   : > { %533 = vmatpush.bf16.msra.mxu1 %v1141_v13 }
  0x27   : > { %778 = vmatpush.bf16.msra.mxu2 %v1152_v59 }
  0x29   : > { %485 = vmatpush.bf16.msra.mxu0 %v1132_v14  ;;  %1210 = vmatpush.bf16.msra.mxu3 %v1132_v14 }
  0x2a   : > { %534 = vmatpush.bf16.msra.mxu1 %v1140_v19 }
  0x2b   : > { %779 = vmatpush.bf16.msra.mxu2 %v1151_v4 }
  0x2c   : > { %486 = vmatmul.bf16.vlgmr.msra.gmra.mxu0 %v956_v22  ;;  %516 = vmatmul.bf16.vlgmr.msra.gmra.mxu3 %v1004_v23 }
  0x2d   : > { %1211 = vmatpush.bf16.msrb.mxu3 %v1147_v1  ;;  %535 = vmatmul.bf16.vlgmr.msra.gmra.mxu1 %v960_v24  ;;  %v997_v1 = vld [vmem:[%s1367_s26 + $0x58] sm:$0xf0] }
  0x31   : > { %1212 = vmatpush.bf16.msrb.mxu3 %v1146_v3  ;;  %v1000_v3 = vor.u32 %v1126_v0, %v997_v1 }
  0x35   : > { %1213 = vmatpush.bf16.msrb.mxu3 %v1145_v5  ;;  %v1150_v5 = vld [vmem:[%s1481_s3 + $0x10] sm:$0xff] }
  0x36   : > { %780 = vmatpush.bf16.msra.mxu2 %v1150_v5 }
  0x39   : > { %1214 = vmatpush.bf16.msrb.mxu3 %v1144_v7  ;;  %v1148_v7 = vld [vmem:[%s1481_s3] sm:$0xff] }
  0x3a   : > { %781 = vmatpush.bf16.msra.mxu2 %v1149_v6 }
  0x3c   : > { %491 = vmatmul.bf16.gmra.mxu0 %v964_v31  ;;  %521 = vmatmul.bf16.gmra.mxu3 %v1012_v32 }
  0x3d   : > { %1215 = vmatpush.bf16.msrb.mxu3 %v1143_v9  ;;  %540 = vmatmul.bf16.gmra.mxu1 %v968_v33 }
  0x3e   : > { %782 = vmatpush.bf16.msra.mxu2 %v1148_v7 }
  0x41   : > { %1216 = vmatpush.bf16.msrb.mxu3 %v1142_v11  ;;  %v1437_v11 = vld [vmem:[%s1480_s2] ss:$0 sm:$0xff] }
  0x45   : > { %1217 = vmatpush.bf16.msrb.mxu3 %v1141_v13 }
  0x49   : > { %1218 = vmatpush.bf16.msrb.mxu3 %v1140_v19 }
  0x4c   : > { %496 = vmatmul.bf16.gmra.mxu0 %v972_v40  ;;  %565 = vmatmul.bf16.vlgmr.msrb.gmra.mxu3 %v1008_v41 }
  0x4d   : > { %545 = vmatmul.bf16.gmra.mxu1 %v976_v42  ;;  %1219 = vmatpush.bf16.msra.mxu3 %v1155_v52 }
  0x51   : > { %1220 = vmatpush.bf16.msra.mxu3 %v1154_v53 }
  0x55   : > { %1221 = vmatpush.bf16.msra.mxu3 %v1153_v54 }
  0x59   : > { %1222 = vmatpush.bf16.msra.mxu3 %v1152_v59 }
  0x5c   : > { %501 = vmatmul.bf16.gmra.mxu0 %v980_v49  ;;  %570 = vmatmul.bf16.gmra.mxu3 %v1016_v50 }
  0x5d   : > { %550 = vmatmul.bf16.gmra.mxu1 %v984_v51  ;;  %1223 = vmatpush.bf16.msra.mxu3 %v1151_v4 }
  0x61   : > { %1224 = vmatpush.bf16.msra.mxu3 %v1150_v5 }
  0x65   : > { %1225 = vmatpush.bf16.msra.mxu3 %v1149_v6 }
  0x69   : > { %1226 = vmatpush.bf16.msra.mxu3 %v1148_v7 }
  0x6c   : > { %506 = vmatmul.bf16.gmra.mxu0 %v988_v60 }
  0x6d   : > { %555 = vmatmul.bf16.gmra.mxu1 %v992_v61 }
  0x7c   : > { %511 = vmatmul.bf16.gmra.mxu0 %v996_v2 }
  0x7d   : > { %560 = vmatmul.bf16.gmra.mxu1 %v1000_v3 }
  0xa9   : > { %v487_v8 = vpop.f32.mrf.mxu0 }
  0xaa   : > { %v536_v9 = vpop.f32.mrf.mxu1 }
  0xab   : > { %v537_v10 = vadd.f32 %v536_v9, %v487_v8 }
  0xad   : > { %v671_v15 = vadd.f32 %v1437_v11, %v537_v10 }
  0xaf   : > { %v517_v12 = vpop.f32.mrf.mxu3  ;;  %v687_v18 = vmax.f32 %v671_v15, 0.0 }
  0xb1   : > { %v489_v13 = vpop.f32.mrf.mxu0 }
  0xb2   : > { %v538_v14 = vpop.f32.mrf.mxu1 }
  0xb3   : > { %v539_v16 = vadd.f32 %v538_v14, %v489_v13 }
  0xb5   : > { %v672_v17 = vadd.f32 %v1437_v11, %v539_v16 }
  0xb7   : > { %v688_v19 = vmax.f32 %v672_v17, 0.0  ;;  %v519_v20 = vpop.f32.mrf.mxu3 }
  0xb9   : > { %v492_v21 = vpop.f32.mrf.mxu0  ;;  %v703_v22 = vpack.c.bf16 %v688_v19, %v687_v18 }
  0xba   : > { %v541_v23 = vpop.f32.mrf.mxu1 }
  0xbb   : > { %783 = vmatmul.bf16.vlgmr.msra.gmra.mxu2 %v703_v22  ;;  %v542_v24 = vadd.f32 %v541_v23, %v492_v21 }
  0xbd   : > { %v673_v28 = vadd.f32 %v1437_v11, %v542_v24 }
  0xbf   : > { %v522_v25 = vpop.f32.mrf.mxu3  ;;  %v689_v31 = vmax.f32 %v673_v28, 0.0 }
  0xc1   : > { %v494_v26 = vpop.f32.mrf.mxu0 }
  0xc2   : > { %v543_v27 = vpop.f32.mrf.mxu1 }
  0xc3   : > { %v544_v29 = vadd.f32 %v543_v27, %v494_v26 }
  0xc5   : > { %v674_v30 = vadd.f32 %v1437_v11, %v544_v29 }
  0xc7   : > { %v690_v32 = vmax.f32 %v674_v30, 0.0  ;;  %v524_v33 = vpop.f32.mrf.mxu3 }
  0xc9   : > { %v497_v34 = vpop.f32.mrf.mxu0  ;;  %v704_v35 = vpack.c.bf16 %v690_v32, %v689_v31 }
  0xca   : > { %v546_v36 = vpop.f32.mrf.mxu1 }
  0xcb   : > { %788 = vmatmul.bf16.gmra.mxu2 %v704_v35  ;;  %v547_v37 = vadd.f32 %v546_v36, %v497_v34 }
  0xcd   : > { %v675_v41 = vadd.f32 %v1437_v11, %v547_v37 }
  0xcf   : > { %v566_v38 = vpop.f32.mrf.mxu3  ;;  %v691_v45 = vmax.f32 %v675_v41, 0.0 }
  0xd0   : > { %v567_v43 = vadd.f32 %v566_v38, %v517_v12 }
  0xd1   : > { %v499_v39 = vpop.f32.mrf.mxu0 }
  0xd2   : > { %v548_v40 = vpop.f32.mrf.mxu1  ;;  %v683_v48 = vadd.f32 %v1437_v11, %v567_v43 }
  0xd3   : > { %v549_v42 = vadd.f32 %v548_v40, %v499_v39 }
  0xd4   : > { %v699_v54 = vmax.f32 %v683_v48, 0.0 }
  0xd5   : > { %v676_v44 = vadd.f32 %v1437_v11, %v549_v42 }
  0xd7   : > { %v692_v46 = vmax.f32 %v676_v44, 0.0  ;;  %v568_v47 = vpop.f32.mrf.mxu3 }
  0xd8   : > { %v569_v49 = vadd.f32 %v568_v47, %v519_v20 }
  0xd9   : > { %v502_v50 = vpop.f32.mrf.mxu0  ;;  %v705_v51 = vpack.c.bf16 %v692_v46, %v691_v45 }
  0xda   : > { %v684_v52 = vadd.f32 %v1437_v11, %v569_v49  ;;  %v551_v53 = vpop.f32.mrf.mxu1 }
  0xdb   : > { %793 = vmatmul.bf16.gmra.mxu2 %v705_v51  ;;  %v552_v57 = vadd.f32 %v551_v53, %v502_v50 }
  0xdc   : > { %v700_v55 = vmax.f32 %v684_v52, 0.0 }
  0xdd   : > { %v677_v61 = vadd.f32 %v1437_v11, %v552_v57 }
  0xde   : > { %v709_v56 = vpack.c.bf16 %v700_v55, %v699_v54 }
  0xdf   : > { %v571_v58 = vpop.f32.mrf.mxu3  ;;  %v693_v1 = vmax.f32 %v677_v61, 0.0 }
  0xe0   : > { %813 = vmatmul.bf16.vlgmr.msra.gmra.mxu3 %v709_v56  ;;  %v572_v63 = vadd.f32 %v571_v58, %v522_v25 }
  0xe1   : > { %v504_v59 = vpop.f32.mrf.mxu0 }
  0xe2   : > { %v553_v60 = vpop.f32.mrf.mxu1  ;;  %v685_v4 = vadd.f32 %v1437_v11, %v572_v63 }
  0xe3   : > { %v554_v62 = vadd.f32 %v553_v60, %v504_v59 }
  0xe4   : > { %v701_v10 = vmax.f32 %v685_v4, 0.0 }
  0xe5   : > { %v678_v0 = vadd.f32 %v1437_v11, %v554_v62 }
  0xe7   : > { %v694_v2 = vmax.f32 %v678_v0, 0.0  ;;  %v573_v3 = vpop.f32.mrf.mxu3 }
  0xe8   : > { %v574_v5 = vadd.f32 %v573_v3, %v524_v33 }
  0xe9   : > { %v507_v6 = vpop.f32.mrf.mxu0  ;;  %v706_v7 = vpack.c.bf16 %v694_v2, %v693_v1 }
  0xea   : > { %v686_v8 = vadd.f32 %v1437_v11, %v574_v5  ;;  %v556_v9 = vpop.f32.mrf.mxu1 }
  0xeb   : > { %798 = vmatmul.bf16.gmra.mxu2 %v706_v7  ;;  %v557_v14 = vadd.f32 %v556_v9, %v507_v6 }
  0xec   : > { %v702_v12 = vmax.f32 %v686_v8, 0.0 }
  0xed   : > { %v679_v17 = vadd.f32 %v1437_v11, %v557_v14 }
  0xee   : > { %v710_v13 = vpack.c.bf16 %v702_v12, %v701_v10 }
  0xef   : > { %v695_v20 = vmax.f32 %v679_v17, 0.0 }
  0xf0   : > { %818 = vmatmul.bf16.gmra.mxu3 %v710_v13 }
  0xf1   : > { %v509_v15 = vpop.f32.mrf.mxu0 }
  0xf2   : > { %v558_v16 = vpop.f32.mrf.mxu1 }
  0xf3   : > { %v559_v18 = vadd.f32 %v558_v16, %v509_v15 }
  0xf5   : > { %v680_v19 = vadd.f32 %v1437_v11, %v559_v18 }
  0xf7   : > { %v696_v21 = vmax.f32 %v680_v19, 0.0 }
  0xf9   : > { %v512_v22 = vpop.f32.mrf.mxu0  ;;  %v707_v23 = vpack.c.bf16 %v696_v21, %v695_v20 }
  0xfa   : > { %v561_v24 = vpop.f32.mrf.mxu1 }
  0xfb   : > { %803 = vmatmul.bf16.gmra.mxu2 %v707_v23  ;;  %v562_v25 = vadd.f32 %v561_v24, %v512_v22 }
  0xfd   : > { %v681_v28 = vadd.f32 %v1437_v11, %v562_v25 }
  0xff   : > { %v697_v31 = vmax.f32 %v681_v28, 0.0 }
 0x101   : > { %v514_v26 = vpop.f32.mrf.mxu0 }
 0x102   : > { %v563_v27 = vpop.f32.mrf.mxu1 }
 0x103   : > { %v564_v29 = vadd.f32 %v563_v27, %v514_v26 }
 0x105   : > { %v682_v30 = vadd.f32 %v1437_v11, %v564_v29 }
 0x107   : > { %v698_v32 = vmax.f32 %v682_v30, 0.0 }
 0x109   : > { %v708_v33 = vpack.c.bf16 %v698_v32, %v697_v31 }
 0x10b   : > { %808 = vmatmul.bf16.gmra.mxu2 %v708_v33 }
 0x13e   : > { %v784_v34 = vpop.f32.mrf.mxu2 }
 0x146   : > { %v786_v35 = vpop.f32.mrf.mxu2 }
 0x147   : > { %v1159_v36 = vpack.c.bf16 %v786_v35, %v784_v34 }
 0x149   : > { %1160 = vst [vmem:[%s1459_s7] sm:$0xff] %v1159_v36  }
 0x14e   : > { %v789_v37 = vpop.f32.mrf.mxu2 }
 0x156   : > { %v791_v11 = vpop.f32.mrf.mxu2 }
 0x157   : > { %v1164_v38 = vpack.c.bf16 %v791_v11, %v789_v37 }
 0x159   : > { %1196 = vst [vmem:[%s1459_s7 + $0x8] sm:$0xff] %v1164_v38  }
 0x15e   : > { %v794_v39 = vpop.f32.mrf.mxu2 }
 0x163   : > { %v814_v40 = vpop.f32.mrf.mxu3 }
 0x166   : > { %v796_v41 = vpop.f32.mrf.mxu2 }
 0x167   : > { %v1169_v42 = vpack.c.bf16 %v796_v41, %v794_v39 }
 0x169   : > { %1197 = vst [vmem:[%s1459_s7 + $0x10] sm:$0xff] %v1169_v42  }
 0x16b   : > { %v816_v43 = vpop.f32.mrf.mxu3 }
 0x16c   : > { %v1189_v44 = vpack.c.bf16 %v816_v43, %v814_v40 }
 0x16e   : > { %1201 = vst [vmem:[%s1459_s7 + $0x30] sm:$0xff] %v1189_v44   ;;  %v799_v45 = vpop.f32.mrf.mxu2 }
 0x173   : > { %v819_v46 = vpop.f32.mrf.mxu3 }
 0x176   : > { %v801_v47 = vpop.f32.mrf.mxu2 }
 0x177   : > { %v1174_v48 = vpack.c.bf16 %v801_v47, %v799_v45 }
 0x179   : > { %1198 = vst [vmem:[%s1459_s7 + $0x18] sm:$0xff] %v1174_v48  }
 0x17b   : > { %v821_v49 = vpop.f32.mrf.mxu3 }
 0x17c   : > { %v1194_v50 = vpack.c.bf16 %v821_v49, %v819_v46 }
 0x17e   : > { %1202 = vst [vmem:[%s1459_s7 + $0x38] sm:$0xff] %v1194_v50   ;;  %v804_v51 = vpop.f32.mrf.mxu2 }
 0x186   : > { %v806_v52 = vpop.f32.mrf.mxu2 }
 0x187   : > { %v1179_v53 = vpack.c.bf16 %v806_v52, %v804_v51 }
 0x189   : > { %1199 = vst [vmem:[%s1459_s7 + $0x20] sm:$0xff] %v1179_v53  }
 0x18e   : > { %v809_v54 = vpop.f32.mrf.mxu2 }
 0x196   : > { %v811_v55 = vpop.f32.mrf.mxu2 }
 0x197   : > { %v1184_v56 = vpack.c.bf16 %v811_v55, %v809_v54 }
 0x199   : > { %1200 = vst [vmem:[%s1459_s7 + $0x28] sm:$0xff] %v1184_v56  }
 0x19a PF: > { %s14_s17 = sadd.s32 1, %s1274_s17   ;;  %s1483_s15 = smov %s1270_s16 }
 0x19b   : > { %p11_p5 = scmp.ge.s32.totalorder %s14_s17, 4   ;;  %s1484_s16 = smov %s1486_s18 }
 0x19d   :  { %13 = sbr.rel (!%p11_p5) target bundleno = 2 (0x2), region = 81 }

// kernel: gcn_forward.4
= control target key start
LH: loop header
LB: loop body
LE: loop exit
PB: predicated region body
PF: predicated region fallthrough
CT: control target
= control target key end

     0   :  { %s1542_s18 = smov 0   ;;  %s1544_s19 = smov 0   ;;  %s1752_s0 = inlined_call_operand.vmem [shape: bf16[256,256], index: 0, kind: input, shape index: {}]   ;;  %s1753_s1 = inlined_call_operand.vmem [shape: bf16[256,128], index: 1, kind: input, shape index: {}]   ;;  %s1754_s2 = inlined_call_operand.vmem [shape: bf16[128,128], index: 2, kind: input, shape index: {}]   ;;  %s1755_s3 = inlined_call_operand.vmem [shape: f32[1,128], index: 3, kind: input, shape index: {}]   ;;  %s1756_s4 = inlined_call_operand.vmem [shape: bf16[128,128], index: 4, kind: input, shape index: {}]   ;;  %s1757_s5 = inlined_call_operand.vmem [shape: bf16[256,128], index: 5, kind: output, shape index: {}]  }
   0x1   :  { %s1546_s20 = smov 0  }
   0x2 LB: > { %s27_s21 = sadd.s32 1, %s1506_s19  ;;  %p1143_p0 = scmp.ge.s32.totalorder %s1510_s20, 1  ;;  %s1510_s20 = sphi %s1546_s20, %s15_s20   ;;  %s1506_s19 = sphi %s1544_s19, %s1759_s19   ;;  %s1502_s18 = sphi %s1542_s18, %s1758_s18  }
   0x3   : > { %p29_p1 = scmp.ge.s32.totalorder %s27_s21, 2  ;;  %p219_p2 = scmp.lt.s32.totalorder %s1510_s20, 3 }
   0x5   : > { %s1761_s21 = smov (%p29_p1, %s27_s21), 0  ;;  %p220_p3 = pnand %p1143_p0, %p219_p2 }
   0x6   : > { %s1144_s28 = sshll.u32 (!%p220_p3), %s1502_s18, 4 }
   0x7   : > { %223 = sbr.rel (%p220_p3) target bundleno = 734 (0x2de), region = 40  ;;  %p259_p4 = scmp.lt.s32.totalorder (!%p220_p3), %s1144_s28, 31 }
   0xc   : > { %v1367_v0 = vld [vmem:[%s1754_s2 + $0x38] sm:$0xff]  ;;  %v1366_v1 = vld [vmem:[%s1754_s2 + $0x30] sm:$0xff]  ;;  %v1365_v2 = vld [vmem:[%s1754_s2 + $0x28] sm:$0xff]  ;;  %s1763_s28 = smov (!%p259_p4, %s1144_s28), 31 }
   0xd   : > { %473 = vmatpush.bf16.msra.mxu0 %v1367_v0  ;;  %1441 = vmatpush.bf16.msra.mxu3 %v1367_v0  ;;  %v1364_v3 = vld [vmem:[%s1754_s2 + $0x20] sm:$0xff]  ;;  %v1363_v4 = vld [vmem:[%s1754_s2 + $0x18] sm:$0xff]  ;;  %v1362_v5 = vld [vmem:[%s1754_s2 + $0x10] sm:$0xff]  ;;  %s1343_s29 = sshll.u32 %s1763_s28, 3  ;;  %s1148_s30 = sshll.u32 %s1763_s28, 2 }
   0xe   : > { %1440 = vmatpush.bf16.msra.mxu2 %v1367_v0  ;;  %1439 = vmatpush.bf16.msra.mxu1 %v1367_v0  ;;  %v1361_v6 = vld [vmem:[%s1754_s2 + $0x8] sm:$0xff]  ;;  %v1360_v7 = vld [vmem:[%s1754_s2] sm:$0xff]  ;;  %v1346_v10 = vld [vmem:[%s1753_s1 + $0x10] sm:$0xff]  ;;  %s1647_s7 = scalar_lea.vmem %s1752_s0, %s1343_s29  ;;  %s1733_s18 = scalar_lea.vmem %s1757_s5, %s1148_s30 }
   0xf   : > { %v1344_v8 = vld [vmem:[%s1753_s1] sm:$0xff]  ;;  %v1345_v9 = vld [vmem:[%s1753_s1 + $0x8] sm:$0xff]  ;;  %v1358_v11 = vld [vmem:[%s1753_s1 + $0x70] sm:$0xff] }
  0x10   : > { %v1356_v12 = vld [vmem:[%s1753_s1 + $0x60] sm:$0xff]  ;;  %v1347_v13 = vld [vmem:[%s1753_s1 + $0x18] sm:$0xff]  ;;  %v1354_v15 = vld [vmem:[%s1753_s1 + $0x50] sm:$0xff] }
  0x11   : > { %474 = vmatpush.bf16.msra.mxu0 %v1366_v1  ;;  %1444 = vmatpush.bf16.msra.mxu3 %v1366_v1  ;;  %v1359_v14 = vld [vmem:[%s1753_s1 + $0x78] sm:$0xff]  ;;  %v1357_v16 = vld [vmem:[%s1753_s1 + $0x68] sm:$0xff]  ;;  %v1348_v17 = vld [vmem:[%s1753_s1 + $0x20] sm:$0xff] }
  0x12   : > { %1443 = vmatpush.bf16.msra.mxu2 %v1366_v1  ;;  %1442 = vmatpush.bf16.msra.mxu1 %v1366_v1  ;;  %v1355_v18 = vld [vmem:[%s1753_s1 + $0x58] sm:$0xff]  ;;  %v1349_v19 = vld [vmem:[%s1753_s1 + $0x28] sm:$0xff]  ;;  %v1350_v20 = vld [vmem:[%s1753_s1 + $0x30] sm:$0xff] }
  0x13   : > { %v1351_v21 = vld [vmem:[%s1753_s1 + $0x38] sm:$0xff]  ;;  %v1352_v22 = vld [vmem:[%s1753_s1 + $0x40] sm:$0xff]  ;;  %v1353_v26 = vld [vmem:[%s1753_s1 + $0x48] sm:$0xff] }
  0x15   : > { %475 = vmatpush.bf16.msra.mxu0 %v1365_v2  ;;  %1447 = vmatpush.bf16.msra.mxu3 %v1365_v2 }
  0x16   : > { %1446 = vmatpush.bf16.msra.mxu2 %v1365_v2  ;;  %1445 = vmatpush.bf16.msra.mxu1 %v1365_v2 }
  0x19   : > { %476 = vmatpush.bf16.msra.mxu0 %v1364_v3  ;;  %1450 = vmatpush.bf16.msra.mxu3 %v1364_v3 }
  0x1a   : > { %1449 = vmatpush.bf16.msra.mxu2 %v1364_v3  ;;  %1448 = vmatpush.bf16.msra.mxu1 %v1364_v3 }
  0x1d   : > { %477 = vmatpush.bf16.msra.mxu0 %v1363_v4  ;;  %1453 = vmatpush.bf16.msra.mxu3 %v1363_v4 }
  0x1e   : > { %1452 = vmatpush.bf16.msra.mxu2 %v1363_v4  ;;  %1451 = vmatpush.bf16.msra.mxu1 %v1363_v4 }
  0x21   : > { %478 = vmatpush.bf16.msra.mxu0 %v1362_v5  ;;  %1456 = vmatpush.bf16.msra.mxu3 %v1362_v5 }
  0x22   : > { %1455 = vmatpush.bf16.msra.mxu2 %v1362_v5  ;;  %1454 = vmatpush.bf16.msra.mxu1 %v1362_v5  ;;  %v1247_v5 = vld [vmem:[%s1647_s7] sm:$0xf] }
  0x25   : > { %479 = vmatpush.bf16.msra.mxu0 %v1361_v6  ;;  %1459 = vmatpush.bf16.msra.mxu3 %v1361_v6 }
  0x26   : > { %1458 = vmatpush.bf16.msra.mxu2 %v1361_v6  ;;  %1457 = vmatpush.bf16.msra.mxu1 %v1361_v6  ;;  %v1369_v6 = vld [vmem:[%s1647_s7 + $0x4] sm:$0xf0] }
  0x29   : > { %480 = vmatpush.bf16.msra.mxu0 %v1360_v7  ;;  %1462 = vmatpush.bf16.msra.mxu3 %v1360_v7 }
  0x2a   : > { %1461 = vmatpush.bf16.msra.mxu2 %v1360_v7  ;;  %1460 = vmatpush.bf16.msra.mxu1 %v1360_v7  ;;  %v1248_v7 = vor.u32 %v1369_v6, %v1247_v5  ;;  %v1711_v5 = vld [vmem:[%s1755_s3] ss:$0 sm:$0xff] }
  0x2c   : > { %481 = vmatmul.bf16.vlgmr.msra.gmra.mxu0 %v1344_v8  ;;  %551 = vmatmul.bf16.vlgmr.msra.gmra.mxu3 %v1358_v11  ;;  %v1249_v11 = vld [vmem:[%s1647_s7 + $0x8] sm:$0xf0] }
  0x2d   : > { %541 = vmatmul.bf16.vlgmr.msra.gmra.mxu2 %v1356_v12  ;;  %531 = vmatmul.bf16.vlgmr.msra.gmra.mxu1 %v1354_v15  ;;  %v1371_v15 = vld [vmem:[%s1647_s7 + $0x14] sm:$0xf0] }
  0x3c   : > { %486 = vmatmul.bf16.gmra.mxu0 %v1345_v9  ;;  %556 = vmatmul.bf16.gmra.mxu3 %v1359_v14  ;;  %v1255_v14 = vld [vmem:[%s1647_s7 + $0x10] sm:$0xf] }
  0x3d   : > { %546 = vmatmul.bf16.gmra.mxu2 %v1357_v16  ;;  %536 = vmatmul.bf16.gmra.mxu1 %v1355_v18  ;;  %v1256_v16 = vor.u32 %v1371_v15, %v1255_v14  ;;  %v1257_v18 = vld [vmem:[%s1647_s7 + $0x18] sm:$0xf0] }
  0x4c   : > { %491 = vmatmul.bf16.gmra.mxu0 %v1346_v10  ;;  %v1368_v10 = vld [vmem:[%s1647_s7 + $0x4] sm:$0xf] }
  0x5c   : > { %496 = vmatmul.bf16.gmra.mxu0 %v1347_v13  ;;  %v1252_v13 = vor.u32 %v1368_v10, %v1249_v11 }
  0x6c   : > { %501 = vmatmul.bf16.gmra.mxu0 %v1348_v17  ;;  %v1370_v17 = vld [vmem:[%s1647_s7 + $0x14] sm:$0xf] }
  0x7c   : > { %506 = vmatmul.bf16.gmra.mxu0 %v1349_v19  ;;  %v1260_v19 = vor.u32 %v1370_v17, %v1257_v18 }
  0x8c   : > { %511 = vmatmul.bf16.gmra.mxu0 %v1350_v20  ;;  %v1263_v20 = vld [vmem:[%s1647_s7 + $0x20] sm:$0xf] }
  0x9c   : > { %516 = vmatmul.bf16.gmra.mxu0 %v1351_v21  ;;  %v1373_v21 = vld [vmem:[%s1647_s7 + $0x24] sm:$0xf0] }
  0xa9   : > { %v1631_v23 = vpop.f32.mrf.mxu0 }
  0xaa   : > { %v532_v39 = vpop.f32.mrf.mxu1 }
  0xac   : > { %521 = vmatmul.bf16.gmra.mxu0 %v1352_v22  ;;  %v1264_v22 = vor.u32 %v1373_v21, %v1263_v20 }
  0xaf   : > { %v552_v33 = vpop.f32.mrf.mxu3 }
  0xb0   : > { %v542_v35 = vpop.f32.mrf.mxu2 }
  0xb1   : > { %v1633_v24 = vpop.f32.mrf.mxu0 }
  0xb2   : > { %v562_v25 = vpack.c.bf16 %v1633_v24, %v1631_v23  ;;  %v534_v43 = vpop.f32.mrf.mxu1  ;;  %v1372_v23 = vld [vmem:[%s1647_s7 + $0x24] sm:$0xf]  ;;  %v1265_v24 = vld [vmem:[%s1647_s7 + $0x28] sm:$0xf0] }
  0xb3   : > { %v572_v56 = vpack.c.bf16 %v534_v43, %v532_v39  ;;  %v1379_v39 = vld [vmem:[%s1647_s7 + $0x54] sm:$0xf0] }
  0xb7   : > { %v554_v36 = vpop.f32.mrf.mxu3 }
  0xb8   : > { %v544_v40 = vpop.f32.mrf.mxu2  ;;  %v576_v47 = vpack.c.bf16 %v554_v36, %v552_v33  ;;  %v1377_v33 = vld [vmem:[%s1647_s7 + $0x44] sm:$0xf0]  ;;  %v1281_v36 = vld [vmem:[%s1647_s7 + $0x48] sm:$0xf0] }
  0xb9   : > { %v487_v27 = vpop.f32.mrf.mxu0  ;;  %v574_v52 = vpack.c.bf16 %v544_v40, %v542_v35  ;;  %v1376_v35 = vld [vmem:[%s1647_s7 + $0x44] sm:$0xf] }
  0xba   : > { %v537_v49 = vpop.f32.mrf.mxu1 }
  0xbc   : > { %526 = vmatmul.bf16.gmra.mxu0 %v1353_v26  ;;  %v1271_v26 = vld [vmem:[%s1647_s7 + $0x30] sm:$0xf] }
  0xbf   : > { %v557_v41 = vpop.f32.mrf.mxu3 }
  0xc0   : > { %v547_v44 = vpop.f32.mrf.mxu2 }
  0xc1   : > { %v489_v28 = vpop.f32.mrf.mxu0 }
  0xc2   : > { %v563_v29 = vpack.c.bf16 %v489_v28, %v487_v27  ;;  %v539_v54 = vpop.f32.mrf.mxu1  ;;  %v1375_v27 = vld [vmem:[%s1647_s7 + $0x34] sm:$0xf0] }
  0xc3   : > { %v573_v55 = vpack.c.bf16 %v539_v54, %v537_v49  ;;  %v1272_v28 = vor.u32 %v1375_v27, %v1271_v26  ;;  %v1389_v49 = vld [vmem:[%s1756_s4 + $0x28] sm:$0xff]  ;;  %v1303_v54 = vld [vmem:[%s1647_s7 + $0x70] sm:$0xf] }
  0xc7   : > { %v559_v45 = vpop.f32.mrf.mxu3 }
  0xc8   : > { %v577_v46 = vpack.c.bf16 %v559_v45, %v557_v41  ;;  %v549_v50 = vpop.f32.mrf.mxu2  ;;  %v1378_v41 = vld [vmem:[%s1647_s7 + $0x54] sm:$0xf]  ;;  %v1295_v45 = vld [vmem:[%s1647_s7 + $0x60] sm:$0xf] }
  0xc9   : > { %v492_v30 = vpop.f32.mrf.mxu0  ;;  %v575_v51 = vpack.c.bf16 %v549_v50, %v547_v44  ;;  %v1391_v44 = vld [vmem:[%s1756_s4 + $0x38] sm:$0xff]  ;;  %v1380_v50 = vld [vmem:[%s1647_s7 + $0x64] sm:$0xf] }
  0xca   : > { %723 = vmatpush.bf16.msrb.mxu2 %v577_v46  ;;  %v1381_v46 = vld [vmem:[%s1647_s7 + $0x64] sm:$0xf0]  ;;  %971 = vmatpush.bf16.msrb.mxu3 %v1391_v44 }
  0xce   : > { %724 = vmatpush.bf16.msrb.mxu2 %v576_v47  ;;  %v1390_v47 = vld [vmem:[%s1756_s4 + $0x30] sm:$0xff] }
  0xcf   : > { %972 = vmatpush.bf16.msrb.mxu3 %v1390_v47 }
  0xd1   : > { %v494_v31 = vpop.f32.mrf.mxu0 }
  0xd2   : > { %v564_v32 = vpack.c.bf16 %v494_v31, %v492_v30  ;;  %725 = vmatpush.bf16.msrb.mxu2 %v575_v51  ;;  %v1273_v30 = vld [vmem:[%s1647_s7 + $0x38] sm:$0xf0]  ;;  %v1297_v51 = vld [vmem:[%s1647_s7 + $0x68] sm:$0xf0] }
  0xd3   : > { %973 = vmatpush.bf16.msrb.mxu3 %v1389_v49 }
  0xd6   : > { %726 = vmatpush.bf16.msrb.mxu2 %v574_v52  ;;  %v1388_v52 = vld [vmem:[%s1756_s4 + $0x20] sm:$0xff] }
  0xd7   : > { %974 = vmatpush.bf16.msrb.mxu3 %v1388_v52 }
  0xd9   : > { %v497_v34 = vpop.f32.mrf.mxu0 }
  0xda   : > { %727 = vmatpush.bf16.msrb.mxu2 %v573_v55  ;;  %v1383_v55 = vld [vmem:[%s1647_s7 + $0x74] sm:$0xf0] }
  0xde   : > { %728 = vmatpush.bf16.msrb.mxu2 %v572_v56  ;;  %v1387_v56 = vld [vmem:[%s1756_s4 + $0x18] sm:$0xff] }
  0xdf   : > { %975 = vmatpush.bf16.msrb.mxu3 %v1387_v56 }
  0xe1   : > { %v499_v37 = vpop.f32.mrf.mxu0 }
  0xe2   : > { %v565_v38 = vpack.c.bf16 %v499_v37, %v497_v34  ;;  %v1284_v37 = vor.u32 %v1376_v35, %v1281_v36 }
  0xe9   : > { %v502_v42 = vpop.f32.mrf.mxu0 }
  0xf1   : > { %v504_v48 = vpop.f32.mrf.mxu0 }
  0xf2   : > { %v566_v2 = vpack.c.bf16 %v504_v48, %v502_v42  ;;  %v1289_v42 = vld [vmem:[%s1647_s7 + $0x58] sm:$0xf0]  ;;  %v1296_v48 = vor.u32 %v1381_v46, %v1295_v45 }
  0xf3   : > { %v1292_v43 = vor.u32 %v1378_v41, %v1289_v42 }
  0xf9   : > { %v507_v53 = vpop.f32.mrf.mxu0 }
 0x101   : > { %v509_v57 = vpop.f32.mrf.mxu0 }
 0x102   : > { %v567_v1 = vpack.c.bf16 %v509_v57, %v507_v53  ;;  %v1300_v53 = vor.u32 %v1380_v50, %v1297_v51  ;;  %v1304_v57 = vor.u32 %v1383_v55, %v1303_v54 }
 0x109   : > { %v512_v58 = vpop.f32.mrf.mxu0 }
 0x111   : > { %v514_v59 = vpop.f32.mrf.mxu0 }
 0x112   : > { %v568_v63 = vpack.c.bf16 %v514_v59, %v512_v58  ;;  %v1386_v58 = vld [vmem:[%s1756_s4 + $0x10] sm:$0xff] }
 0x113   : > { %v1382_v59 = vld [vmem:[%s1647_s7 + $0x74] sm:$0xf]  ;;  %976 = vmatpush.bf16.msrb.mxu3 %v1386_v58 }
 0x119   : > { %v517_v60 = vpop.f32.mrf.mxu0 }
 0x121   : > { %v519_v61 = vpop.f32.mrf.mxu0 }
 0x122   : > { %v569_v62 = vpack.c.bf16 %v519_v61, %v517_v60  ;;  %v1305_v60 = vld [vmem:[%s1647_s7 + $0x78] sm:$0xf0]  ;;  %v1385_v61 = vld [vmem:[%s1756_s4 + $0x8] sm:$0xff] }
 0x123   : > { %977 = vmatpush.bf16.msrb.mxu3 %v1385_v61 }
 0x124   : > { %674 = vmatpush.bf16.msrb.mxu1 %v569_v62  ;;  %v1308_v62 = vor.u32 %v1382_v59, %v1305_v60 }
 0x128   : > { %675 = vmatpush.bf16.msrb.mxu1 %v568_v63  ;;  %v1384_v63 = vld [vmem:[%s1756_s4] sm:$0xff] }
 0x129   : > { %v522_v0 = vpop.f32.mrf.mxu0  ;;  %978 = vmatpush.bf16.msrb.mxu3 %v1384_v63 }
 0x12c   : > { %676 = vmatpush.bf16.msrb.mxu1 %v567_v1 }
 0x130   : > { %677 = vmatpush.bf16.msrb.mxu1 %v566_v2 }
 0x131   : > { %v524_v3 = vpop.f32.mrf.mxu0 }
 0x132   : > { %v570_v12 = vpack.c.bf16 %v524_v3, %v522_v0 }
 0x134   : > { %678 = vmatpush.bf16.msrb.mxu1 %v565_v38  ;;  %v1287_v38 = vld [vmem:[%s1647_s7 + $0x50] sm:$0xf] }
 0x135   : > { %v1288_v40 = vor.u32 %v1379_v39, %v1287_v38 }
 0x138   : > { %679 = vmatpush.bf16.msrb.mxu1 %v564_v32  ;;  %v1279_v32 = vld [vmem:[%s1647_s7 + $0x40] sm:$0xf] }
 0x139   : > { %v527_v4 = vpop.f32.mrf.mxu0  ;;  %v1280_v34 = vor.u32 %v1377_v33, %v1279_v32 }
 0x13c   : > { %680 = vmatpush.bf16.msrb.mxu1 %v563_v29  ;;  %v1374_v29 = vld [vmem:[%s1647_s7 + $0x34] sm:$0xf] }
 0x13d   : > { %v1276_v31 = vor.u32 %v1374_v29, %v1273_v30 }
 0x140   : > { %681 = vmatpush.bf16.msrb.mxu1 %v562_v25  ;;  %v1268_v25 = vor.u32 %v1372_v23, %v1265_v24 }
 0x141   : > { %v529_v8 = vpop.f32.mrf.mxu0 }
 0x142   : > { %v571_v9 = vpack.c.bf16 %v529_v8, %v527_v4 }
 0x143   : > { %682 = vmatmul.bf16.vlgmr.msrb.gmra.mxu1 %v1248_v7 }
 0x144   : > { %729 = vmatpush.bf16.msrb.mxu2 %v571_v9 }
 0x148   : > { %730 = vmatpush.bf16.msrb.mxu2 %v570_v12 }
 0x14b   : > { %731 = vmatmul.bf16.vlgmr.msrb.gmra.mxu2 %v1252_v13 }
 0x153   : > { %687 = vmatmul.bf16.gmra.mxu1 %v1256_v16 }
 0x15b   : > { %736 = vmatmul.bf16.gmra.mxu2 %v1260_v19 }
 0x163   : > { %692 = vmatmul.bf16.gmra.mxu1 %v1264_v22 }
 0x16b   : > { %741 = vmatmul.bf16.gmra.mxu2 %v1268_v25 }
 0x173   : > { %697 = vmatmul.bf16.gmra.mxu1 %v1272_v28 }
 0x17b   : > { %746 = vmatmul.bf16.gmra.mxu2 %v1276_v31 }
 0x183   : > { %702 = vmatmul.bf16.gmra.mxu1 %v1280_v34 }
 0x18b   : > { %751 = vmatmul.bf16.gmra.mxu2 %v1284_v37 }
 0x193   : > { %707 = vmatmul.bf16.gmra.mxu1 %v1288_v40 }
 0x19b   : > { %756 = vmatmul.bf16.gmra.mxu2 %v1292_v43 }
 0x1a3   : > { %712 = vmatmul.bf16.gmra.mxu1 %v1296_v48 }
 0x1ab   : > { %761 = vmatmul.bf16.gmra.mxu2 %v1300_v53 }
 0x1b3   : > { %717 = vmatmul.bf16.gmra.mxu1 %v1304_v57 }
 0x1bb   : > { %766 = vmatmul.bf16.gmra.mxu2 %v1308_v62 }
 0x1c0   : > { %v683_v0 = vpop.f32.mrf.mxu1 }
 0x1c8   : > { %v685_v1 = vpop.f32.mrf.mxu1 }
 0x1ce   : > { %v732_v2 = vpop.f32.mrf.mxu2 }
 0x1cf   : > { %v733_v4 = vadd.f32 %v732_v2, %v683_v0 }
 0x1d0   : > { %v688_v3 = vpop.f32.mrf.mxu1 }
 0x1d1   : > { %v867_v7 = vadd.f32 %v1711_v5, %v733_v4 }
 0x1d3   : > { %v883_v11 = vmax.f32 %v867_v7, 0.0 }
 0x1d6   : > { %v734_v6 = vpop.f32.mrf.mxu2 }
 0x1d7   : > { %v735_v8 = vadd.f32 %v734_v6, %v685_v1 }
 0x1d8   : > { %v690_v9 = vpop.f32.mrf.mxu1 }
 0x1d9   : > { %v868_v10 = vadd.f32 %v1711_v5, %v735_v8 }
 0x1db   : > { %v884_v12 = vmax.f32 %v868_v10, 0.0 }
 0x1dd   : > { %v899_v13 = vpack.c.bf16 %v884_v12, %v883_v11 }
 0x1de   : > { %v737_v14 = vpop.f32.mrf.mxu2 }
 0x1df   : > { %979 = vmatmul.bf16.vlgmr.msrb.gmra.mxu3 %v899_v13  ;;  %v738_v16 = vadd.f32 %v737_v14, %v688_v3 }
 0x1e0   : > { %v693_v15 = vpop.f32.mrf.mxu1 }
 0x1e1   : > { %v869_v18 = vadd.f32 %v1711_v5, %v738_v16 }
 0x1e3   : > { %v885_v22 = vmax.f32 %v869_v18, 0.0 }
 0x1e6   : > { %v739_v17 = vpop.f32.mrf.mxu2 }
 0x1e7   : > { %v740_v19 = vadd.f32 %v739_v17, %v690_v9 }
 0x1e8   : > { %v695_v20 = vpop.f32.mrf.mxu1 }
 0x1e9   : > { %v870_v21 = vadd.f32 %v1711_v5, %v740_v19 }
 0x1eb   : > { %v886_v23 = vmax.f32 %v870_v21, 0.0 }
 0x1ed   : > { %v900_v24 = vpack.c.bf16 %v886_v23, %v885_v22 }
 0x1ee   : > { %v742_v25 = vpop.f32.mrf.mxu2 }
 0x1ef   : > { %984 = vmatmul.bf16.gmra.mxu3 %v900_v24  ;;  %v743_v27 = vadd.f32 %v742_v25, %v693_v15 }
 0x1f0   : > { %v698_v26 = vpop.f32.mrf.mxu1 }
 0x1f1   : > { %v871_v29 = vadd.f32 %v1711_v5, %v743_v27 }
 0x1f3   : > { %v887_v33 = vmax.f32 %v871_v29, 0.0 }
 0x1f6   : > { %v744_v28 = vpop.f32.mrf.mxu2 }
 0x1f7   : > { %v745_v30 = vadd.f32 %v744_v28, %v695_v20 }
 0x1f8   : > { %v700_v31 = vpop.f32.mrf.mxu1 }
 0x1f9   : > { %v872_v32 = vadd.f32 %v1711_v5, %v745_v30 }
 0x1fb   : > { %v888_v34 = vmax.f32 %v872_v32, 0.0 }
 0x1fd   : > { %v901_v35 = vpack.c.bf16 %v888_v34, %v887_v33 }
 0x1fe   : > { %v747_v36 = vpop.f32.mrf.mxu2 }
 0x1ff   : > { %989 = vmatmul.bf16.gmra.mxu3 %v901_v35  ;;  %v748_v38 = vadd.f32 %v747_v36, %v698_v26 }
 0x200   : > { %v703_v37 = vpop.f32.mrf.mxu1 }
 0x201   : > { %v873_v40 = vadd.f32 %v1711_v5, %v748_v38 }
 0x203   : > { %v889_v44 = vmax.f32 %v873_v40, 0.0 }
 0x206   : > { %v749_v39 = vpop.f32.mrf.mxu2 }
 0x207   : > { %v750_v41 = vadd.f32 %v749_v39, %v700_v31 }
 0x208   : > { %v705_v43 = vpop.f32.mrf.mxu1 }
 0x209   : > { %v874_v42 = vadd.f32 %v1711_v5, %v750_v41 }
 0x20b   : > { %v890_v45 = vmax.f32 %v874_v42, 0.0 }
 0x20d   : > { %v902_v46 = vpack.c.bf16 %v890_v45, %v889_v44 }
 0x20e   : > { %v752_v47 = vpop.f32.mrf.mxu2 }
 0x20f   : > { %994 = vmatmul.bf16.gmra.mxu3 %v902_v46  ;;  %v753_v48 = vadd.f32 %v752_v47, %v703_v37 }
 0x210   : > { %v708_v49 = vpop.f32.mrf.mxu1 }
 0x211   : > { %v875_v51 = vadd.f32 %v1711_v5, %v753_v48 }
 0x213   : > { %v891_v54 = vmax.f32 %v875_v51, 0.0 }
 0x216   : > { %v754_v50 = vpop.f32.mrf.mxu2 }
 0x217   : > { %v755_v52 = vadd.f32 %v754_v50, %v705_v43 }
 0x218   : > { %v710_v58 = vpop.f32.mrf.mxu1 }
 0x219   : > { %v876_v53 = vadd.f32 %v1711_v5, %v755_v52 }
 0x21b   : > { %v892_v55 = vmax.f32 %v876_v53, 0.0 }
 0x21d   : > { %v903_v56 = vpack.c.bf16 %v892_v55, %v891_v54 }
 0x21e   : > { %v757_v57 = vpop.f32.mrf.mxu2 }
 0x21f   : > { %999 = vmatmul.bf16.gmra.mxu3 %v903_v56  ;;  %v758_v59 = vadd.f32 %v757_v57, %v708_v49 }
 0x220   : > { %v713_v63 = vpop.f32.mrf.mxu1 }
 0x221   : > { %v877_v61 = vadd.f32 %v1711_v5, %v758_v59 }
 0x223   : > { %v893_v1 = vmax.f32 %v877_v61, 0.0 }
 0x226   : > { %v759_v60 = vpop.f32.mrf.mxu2 }
 0x227   : > { %v760_v62 = vadd.f32 %v759_v60, %v710_v58 }
 0x228   : > { %v715_v6 = vpop.f32.mrf.mxu1 }
 0x229   : > { %v878_v0 = vadd.f32 %v1711_v5, %v760_v62 }
 0x22b   : > { %v894_v2 = vmax.f32 %v878_v0, 0.0 }
 0x22d   : > { %v904_v3 = vpack.c.bf16 %v894_v2, %v893_v1 }
 0x22e   : > { %v762_v4 = vpop.f32.mrf.mxu2 }
 0x22f   : > { %1004 = vmatmul.bf16.gmra.mxu3 %v904_v3  ;;  %v763_v7 = vadd.f32 %v762_v4, %v713_v63 }
 0x230   : > { %v718_v14 = vpop.f32.mrf.mxu1 }
 0x231   : > { %v879_v9 = vadd.f32 %v1711_v5, %v763_v7 }
 0x233   : > { %v895_v12 = vmax.f32 %v879_v9, 0.0 }
 0x236   : > { %v764_v8 = vpop.f32.mrf.mxu2 }
 0x237   : > { %v765_v10 = vadd.f32 %v764_v8, %v715_v6 }
 0x238   : > { %v720_v18 = vpop.f32.mrf.mxu1 }
 0x239   : > { %v880_v11 = vadd.f32 %v1711_v5, %v765_v10 }
 0x23b   : > { %v896_v13 = vmax.f32 %v880_v11, 0.0 }
 0x23d   : > { %v905_v15 = vpack.c.bf16 %v896_v13, %v895_v12 }
 0x23e   : > { %v767_v16 = vpop.f32.mrf.mxu2 }
 0x23f   : > { %1009 = vmatmul.bf16.gmra.mxu3 %v905_v15  ;;  %v768_v17 = vadd.f32 %v767_v16, %v718_v14 }
 0x241   : > { %v881_v20 = vadd.f32 %v1711_v5, %v768_v17 }
 0x243   : > { %v897_v23 = vmax.f32 %v881_v20, 0.0 }
 0x246   : > { %v769_v19 = vpop.f32.mrf.mxu2 }
 0x247   : > { %v770_v21 = vadd.f32 %v769_v19, %v720_v18 }
 0x249   : > { %v882_v22 = vadd.f32 %v1711_v5, %v770_v21 }
 0x24b   : > { %v898_v24 = vmax.f32 %v882_v22, 0.0 }
 0x24d   : > { %v906_v25 = vpack.c.bf16 %v898_v24, %v897_v23 }
 0x24f   : > { %1014 = vmatmul.bf16.gmra.mxu3 %v906_v25 }
 0x262   : > { %v980_v26 = vpop.f32.mrf.mxu3 }
 0x26a   : > { %v982_v27 = vpop.f32.mrf.mxu3 }
 0x26b   : > { %v1395_v28 = vpack.c.bf16 %v982_v27, %v980_v26 }
 0x26d   : > { %1396 = vst [vmem:[%s1733_s18] sm:$0xff] %v1395_v28  }
 0x272   : > { %v985_v5 = vpop.f32.mrf.mxu3 }
 0x27a   : > { %v987_v29 = vpop.f32.mrf.mxu3 }
 0x27b   : > { %v1400_v30 = vpack.c.bf16 %v987_v29, %v985_v5 }
 0x27d   : > { %1432 = vst [vmem:[%s1733_s18 + $0x8] sm:$0xff] %v1400_v30  }
 0x282   : > { %v990_v31 = vpop.f32.mrf.mxu3 }
 0x28a   : > { %v992_v32 = vpop.f32.mrf.mxu3 }
 0x28b   : > { %v1405_v33 = vpack.c.bf16 %v992_v32, %v990_v31 }
 0x28d   : > { %1433 = vst [vmem:[%s1733_s18 + $0x10] sm:$0xff] %v1405_v33  }
 0x292   : > { %v995_v34 = vpop.f32.mrf.mxu3 }
 0x29a   : > { %v997_v35 = vpop.f32.mrf.mxu3 }
 0x29b   : > { %v1410_v36 = vpack.c.bf16 %v997_v35, %v995_v34 }
 0x29d   : > { %1434 = vst [vmem:[%s1733_s18 + $0x18] sm:$0xff] %v1410_v36  }
 0x2a2   : > { %v1000_v37 = vpop.f32.mrf.mxu3 }
 0x2aa   : > { %v1002_v38 = vpop.f32.mrf.mxu3 }
 0x2ab   : > { %v1415_v39 = vpack.c.bf16 %v1002_v38, %v1000_v37 }
 0x2ad   : > { %1435 = vst [vmem:[%s1733_s18 + $0x20] sm:$0xff] %v1415_v39  }
 0x2b2   : > { %v1005_v40 = vpop.f32.mrf.mxu3 }
 0x2ba   : > { %v1007_v41 = vpop.f32.mrf.mxu3 }
 0x2bb   : > { %v1420_v42 = vpack.c.bf16 %v1007_v41, %v1005_v40 }
 0x2bd   : > { %1436 = vst [vmem:[%s1733_s18 + $0x28] sm:$0xff] %v1420_v42  }
 0x2c2   : > { %v1010_v43 = vpop.f32.mrf.mxu3 }
 0x2ca   : > { %v1012_v44 = vpop.f32.mrf.mxu3 }
 0x2cb   : > { %v1425_v45 = vpack.c.bf16 %v1012_v44, %v1010_v43 }
 0x2cd   : > { %1437 = vst [vmem:[%s1733_s18 + $0x30] sm:$0xff] %v1425_v45  }
 0x2d2   : > { %v1015_v46 = vpop.f32.mrf.mxu3 }
 0x2da   : > { %v1017_v47 = vpop.f32.mrf.mxu3 }
 0x2db   : > { %v1430_v48 = vpack.c.bf16 %v1017_v47, %v1015_v46 }
 0x2dd   : > { %1438 = vst [vmem:[%s1733_s18 + $0x38] sm:$0xff] %v1430_v48  }
 0x2de PF: > { %s15_s20 = sadd.s32 1, %s1510_s20   ;;  %s1758_s18 = smov %s1506_s19 }
 0x2df   : > { %p12_p5 = scmp.ge.s32.totalorder %s15_s20, 4   ;;  %s1759_s19 = smov %s1761_s21 }
 0x2e1   :  { %14 = sbr.rel (!%p12_p5) target bundleno = 2 (0x2), region = 85 }

// kernel: gcn_forward.7
= control target key start
LH: loop header
LB: loop body
LE: loop exit
PB: predicated region body
PF: predicated region fallthrough
CT: control target
= control target key end

     0   :  { %s625_s0 = inlined_call_operand.vmem [shape: bf16[2,256], index: 0, kind: input, shape index: {}]   ;;  %s626_s1 = inlined_call_operand.vmem [shape: bf16[256,128], index: 1, kind: input, shape index: {}]   ;;  %s627_s2 = inlined_call_operand.vmem [shape: f32[128,128], index: 2, kind: input, shape index: {}]   ;;  %s628_s3 = inlined_call_operand.vmem [shape: f32[1,128], index: 3, kind: input, shape index: {}]   ;;  %s629_s4 = inlined_call_operand.vmem [shape: f32[128,128], index: 4, kind: input, shape index: {}]   ;;  %s630_s5 = inlined_call_operand.vmem [shape: f32[1,128], index: 5, kind: input, shape index: {}]   ;;  %s631_s6 = inlined_call_operand.hbm [shape: f32[2,128], index: 6, kind: output, shape index: {}]  }
   0x1   :  { %v391_v0 = vld [vmem:[%s626_s1 + $0x38] sm:$0xff]  ;;  %v390_v2 = vld [vmem:[%s626_s1 + $0x30] sm:$0xff]  ;;  %v24_v4 = vld [vmem:[%s625_s0] sm:$0x3] }
   0x2   :  { %v399_v1 = vld [vmem:[%s626_s1 + $0x78] sm:$0xff]  ;;  %159 = vmatpush.bf16.msra.mxu0 %v391_v0  ;;  %v398_v3 = vld [vmem:[%s626_s1 + $0x70] sm:$0xff]  ;;  %v389_v6 = vld [vmem:[%s626_s1 + $0x28] sm:$0xff]  ;;  %58 = vst [vmem:[#allocation1] ss:$9 sm:$0xff] %v24_v4 }
   0x3   :  { %172 = vmatpush.bf16.msra.mxu1 %v399_v1  ;;  %v216_v5 = vld [vmem:[%s627_s2 + $0x78] sm:$0xff]  ;;  %v397_v7 = vld [vmem:[%s626_s1 + $0x68] sm:$0xff]  ;;  %v215_v8 = vld [vmem:[%s627_s2 + $0x70] sm:$0xff] }
   0x4   :  { %221 = vmatpush.msra.mxu2 %v216_v5  ;;  %v214_v9 = vld [vmem:[%s627_s2 + $0x68] sm:$0xff] }
   0x6   :  { %160 = vmatpush.bf16.msra.mxu0 %v390_v2  ;;  %222 = vmatpush.msra.mxu2 %v215_v8 }
   0x7   :  { %173 = vmatpush.bf16.msra.mxu1 %v398_v3 }
   0x8   :  { %11 = vsyncpa [#allocation4], 0  ;;  %v388_v10 = vld [vmem:[%s626_s1 + $0x20] sm:$0xff]  ;;  %223 = vmatpush.msra.mxu2 %v214_v9  ;;  %v212_v13 = vld [vmem:[%s627_s2 + $0x58] sm:$0xff]  ;;  %vm282_vm0 = vcmask 1041408   ;;  %s311_s20 = sshll.u32 %s631_s6, 4  ;;  %s312_s20 = int_to_ptr.hbm [resolvable:$true] %s311_s20 }
   0x9   :  { %v396_v11 = vld [vmem:[%s626_s1 + $0x60] sm:$0xff]  ;;  %v387_v14 = vld [vmem:[%s626_s1 + $0x18] sm:$0xff]  ;;  %v211_v16 = vld [vmem:[%s627_s2 + $0x50] sm:$0xff] }
   0xa   :  { %161 = vmatpush.bf16.msra.mxu0 %v389_v6  ;;  %v213_v12 = vld [vmem:[%s627_s2 + $0x60] sm:$0xff]  ;;  %v395_v15 = vld [vmem:[%s626_s1 + $0x58] sm:$0xff]  ;;  %v210_v17 = vld [vmem:[%s627_s2 + $0x48] sm:$0xff] }
   0xb   :  { %174 = vmatpush.bf16.msra.mxu1 %v397_v7  ;;  %224 = vmatpush.msra.mxu2 %v213_v12  ;;  %v386_v18 = vld [vmem:[%s626_s1 + $0x10] sm:$0xff]  ;;  %v209_v20 = vld [vmem:[%s627_s2 + $0x40] sm:$0xff]  ;;  %v208_v21 = vld [vmem:[%s627_s2 + $0x38] sm:$0xff] }
   0xc   :  { %v394_v19 = vld [vmem:[%s626_s1 + $0x50] sm:$0xff]  ;;  %v385_v22 = vld [vmem:[%s626_s1 + $0x8] sm:$0xff]  ;;  %v384_v25 = vld [vmem:[%s626_s1] sm:$0xff] }
   0xd   :  { %225 = vmatpush.msra.mxu2 %v212_v13  ;;  %v393_v23 = vld [vmem:[%s626_s1 + $0x48] sm:$0xff]  ;;  %v207_v24 = vld [vmem:[%s627_s2 + $0x30] sm:$0xff]  ;;  %v392_v26 = vld [vmem:[%s626_s1 + $0x40] sm:$0xff] }
   0xe   :  { %162 = vmatpush.bf16.msra.mxu0 %v388_v10  ;;  %v59_v27 = vld [vmem:[#allocation1] sm:$0xff]  ;;  %v60_v28 = vld [vmem:[#allocation1 + $0x9] sm:$0xff]  ;;  %v204_v31 = vld [vmem:[%s627_s2 + $0x18] sm:$0xff] }
   0xf   :  { %175 = vmatpush.bf16.msra.mxu1 %v396_v11  ;;  %226 = vmatpush.msra.mxu2 %v211_v16  ;;  %v206_v29 = vld [vmem:[%s627_s2 + $0x28] sm:$0xff]  ;;  %v205_v30 = vld [vmem:[%s627_s2 + $0x20] sm:$0xff]  ;;  %v203_v32 = vld [vmem:[%s627_s2 + $0x10] sm:$0xff] }
  0x10   :  { %v202_v33 = vld [vmem:[%s627_s2 + $0x8] sm:$0xff]  ;;  %v201_v34 = vld [vmem:[%s627_s2] sm:$0xff]  ;;  %v257_v35 = vld [vmem:[%s629_s4 + $0x78] sm:$0xff] }
  0x11   :  { %227 = vmatpush.msra.mxu2 %v210_v17  ;;  %v256_v36 = vld [vmem:[%s629_s4 + $0x70] sm:$0xff]  ;;  %262 = vmatpush.msra.mxu3 %v257_v35  ;;  %v255_v37 = vld [vmem:[%s629_s4 + $0x68] sm:$0xff]  ;;  %v254_v38 = vld [vmem:[%s629_s4 + $0x60] sm:$0xff] }
  0x12   :  { %163 = vmatpush.bf16.msra.mxu0 %v387_v14  ;;  %v253_v39 = vld [vmem:[%s629_s4 + $0x58] sm:$0xff]  ;;  %v252_v40 = vld [vmem:[%s629_s4 + $0x50] sm:$0xff]  ;;  %v251_v41 = vld [vmem:[%s629_s4 + $0x48] sm:$0xff] }
  0x13   :  { %176 = vmatpush.bf16.msra.mxu1 %v395_v15  ;;  %228 = vmatpush.msra.mxu2 %v209_v20  ;;  %v250_v42 = vld [vmem:[%s629_s4 + $0x40] sm:$0xff]  ;;  %v249_v43 = vld [vmem:[%s629_s4 + $0x38] sm:$0xff]  ;;  %v248_v44 = vld [vmem:[%s629_s4 + $0x30] sm:$0xff] }
  0x14   :  { %263 = vmatpush.msra.mxu3 %v256_v36  ;;  %v247_v45 = vld [vmem:[%s629_s4 + $0x28] sm:$0xff]  ;;  %v246_v46 = vld [vmem:[%s629_s4 + $0x20] sm:$0xff]  ;;  %v245_v50 = vld [vmem:[%s629_s4 + $0x18] sm:$0xff] }
  0x15   :  { %229 = vmatpush.msra.mxu2 %v208_v21  ;;  %v244_v54 = vld [vmem:[%s629_s4 + $0x10] sm:$0xff]  ;;  %v243_v55 = vld [vmem:[%s629_s4 + $0x8] sm:$0xff]  ;;  %v242_v56 = vld [vmem:[%s629_s4] sm:$0xff] }
  0x16   :  { %164 = vmatpush.bf16.msra.mxu0 %v386_v18  ;;  %264 = vmatpush.msra.mxu3 %v255_v37  ;;  %v401_v57 = vld [vmem:[%s628_s3] ss:$0 sm:$0xff]  ;;  %s433_s3 = smov [#allocation3]  }
  0x17   :  { %177 = vmatpush.bf16.msra.mxu1 %v394_v19  ;;  %230 = vmatpush.msra.mxu2 %v207_v24  ;;  %v402_v61 = vld [vmem:[%s630_s5] ss:$0 sm:$0xff]  ;;  %s309_s4 = sshll.u32 %s433_s3, 4  ;;  %s310_s4 = int_to_ptr.vmem [resolvable:$true] %s309_s4 }
  0x18   :  { %265 = vmatpush.msra.mxu3 %v254_v38 }
  0x19   :  { %231 = vmatpush.msra.mxu2 %v206_v29 }
  0x1a   :  { %165 = vmatpush.bf16.msra.mxu0 %v385_v22  ;;  %266 = vmatpush.msra.mxu3 %v253_v39 }
  0x1b   :  { %178 = vmatpush.bf16.msra.mxu1 %v393_v23  ;;  %232 = vmatpush.msra.mxu2 %v205_v30 }
  0x1c   :  { %267 = vmatpush.msra.mxu3 %v252_v40 }
  0x1d   :  { %233 = vmatpush.msra.mxu2 %v204_v31 }
  0x1e   :  { %166 = vmatpush.bf16.msra.mxu0 %v384_v25  ;;  %268 = vmatpush.msra.mxu3 %v251_v41 }
  0x1f   :  { %179 = vmatpush.bf16.msra.mxu1 %v392_v26  ;;  %234 = vmatpush.msra.mxu2 %v203_v32 }
  0x20   :  { %269 = vmatpush.msra.mxu3 %v250_v42 }
  0x21   :  { %167 = vmatmul.bf16.vlgmr.msra.gmra.mxu0 %v59_v27  ;;  %235 = vmatpush.msra.mxu2 %v202_v33 }
  0x22   :  { %180 = vmatmul.bf16.vlgmr.msra.gmra.mxu1 %v60_v28  ;;  %270 = vmatpush.msra.mxu3 %v249_v43 }
  0x23   :  { %236 = vmatpush.msra.mxu2 %v201_v34 }
  0x24   :  { %271 = vmatpush.msra.mxu3 %v248_v44 }
  0x26   :  { %272 = vmatpush.msra.mxu3 %v247_v45 }
  0x28   :  { %273 = vmatpush.msra.mxu3 %v246_v46 }
  0x2a   :  { %274 = vmatpush.msra.mxu3 %v245_v50 }
  0x2c   :  { %275 = vmatpush.msra.mxu3 %v244_v54 }
  0x2e   :  { %276 = vmatpush.msra.mxu3 %v243_v55 }
  0x30   :  { %277 = vmatpush.msra.mxu3 %v242_v56 }
  0x9e   :  { %v168_v47 = vpop.f32.mrf.mxu0 }
  0x9f   :  { %v181_v48 = vpop.f32.mrf.mxu1 }
  0xa0   :  { %v182_v49 = vadd.f32 %v181_v48, %v168_v47 }
  0xa2   :  { %189 = vst [vmem:[#allocation2] sm:$0x3] %v182_v49 }
  0xa6   :  { %v170_v51 = vpop.f32.mrf.mxu0 }
  0xa7   :  { %v183_v52 = vpop.f32.mrf.mxu1 }
  0xa9   :  { %v200_v53 = vld [vmem:[#allocation2] sm:$0x3] }
  0xaa   :  { %237 = vmatmul.f32.vlgmr.msra.gmra.mxu2 %v200_v53 }
 0x12d   :  { %v238_v58 = vpop.f32.mrf.mxu2 }
 0x12e   :  { %v239_v59 = vadd.f32 %v401_v57, %v238_v58 }
 0x130   :  { %v241_v60 = vmax.f32 %v239_v59, 0.0 }
 0x132   :  { %278 = vmatmul.f32.vlgmr.msra.gmra.mxu3 %v241_v60 }
 0x1b5   :  { %v279_v62 = vpop.f32.mrf.mxu3 }
 0x1b6   :  { %v280_v63 = vadd.f32 %v402_v61, %v279_v62 }
 0x1b8   :  { %v283_v0 = vsel %vm282_vm0, %v280_v63, -inf }
 0x1b9   :  { %v284_v1 = vrot.slane %v283_v0, 4 }
 0x1bb   :  { %v285_v2 = vmax.f32 %v283_v0, %v284_v1 }
 0x1bd   :  { %v286_v3 = vrot.slane %v285_v2, 2 }
 0x1bf   :  { %v287_v4 = vmax.f32 %v285_v2, %v286_v3 }
 0x1c1   :  { %v288_v5 = vrot.slane %v287_v4, 1 }
 0x1c3   :  { %v289_v6 = vmax.f32 %v287_v4, %v288_v5 }
 0x1c5   :  { %v290_v7 = vsub.f32 %v280_v63, %v289_v6 }
 0x1c7   :  { %v291_v8 = vmul.f32 1.442695, %v290_v7 }
 0x1c9   :  { %403 = vpow2.f32 %v291_v8 }
 0x1cf   :  { %v404_v9 = vpop.eup %403 }
 0x1d0   :  { %v293_v10 = vsel %vm282_vm0, %v404_v9, 0.0 }
 0x1d1   :  { %v294_v11 = vrot.slane %v293_v10, 4 }
 0x1d3   :  { %v295_v12 = vadd.f32 %v294_v11, %v293_v10 }
 0x1d5   :  { %v296_v13 = vrot.slane %v295_v12, 2 }
 0x1d7   :  { %v297_v14 = vadd.f32 %v296_v13, %v295_v12 }
 0x1d9   :  { %v298_v15 = vrot.slane %v297_v14, 1 }
 0x1db   :  { %v299_v16 = vadd.f32 %v298_v15, %v297_v14 }
 0x1dd   :  { %405 = vlog2.f32 %v299_v16 }
 0x1e3   :  { %v406_v17 = vpop.eup %405 }
 0x1e4   :  { %v301_v18 = vmul.f32 0.6931472, %v406_v17 }
 0x1e6   :  { %v302_v19 = vsub.f32 %v290_v7, %v301_v18 }
 0x1e8   :  { %303 = vst [vmem:[#allocation3] sm:$0x3] %v302_v19 }
 0x1e9   :  { %314 = dma.vmem_to_hbm [thread:$0]  %s310_s4, 32, %s312_s20, [#allocation4]  }
 0x1ea   :  { %431 = dma.done.wait [#allocation4], 32  }
 0x1eb   :  { %432 = vsyncadd [#allocation4], 4294967264 }
 0x1ec   :  { %319 = vsyncpa [#allocation4], 1 }

</bundles_post_ra>
